<compile_context>
chip_gen: v7x
topology: tpu7x:2x2x1
jax: 0.10.0
libtpu: 0.0.40
codegen_flags: <defaults>
</compile_context>

<pallas_src>
import functools
import math

import jax
import jax.numpy as jnp
from jax.experimental import pallas as pl
from jax.experimental.pallas import tpu as pltpu


def _round_up(a, b):
    return (a + b - 1) // b * b


def _tpu_vmem_budget():
    """Per-generation VMEM budgeting (v5e/v6e: 128 MiB physical, v7x: 64 MiB)."""
    try:
        cap = int(pltpu.get_tpu_info().vmem_capacity_bytes)
    except Exception:  # pragma: no cover - conservative fallback
        cap = 64 * 1024 * 1024
    limit = min(int(cap * 0.6), 96 * 1024 * 1024)
    return limit, int(limit * 0.6)


def _choose_row_tile(Hmax, Wmax, C, K, out_pad, budget_bytes):
    """Largest row-tile TH whose per-grid-step working set fits the VMEM budget."""
    resident = 2 * (Hmax + 2) * (Wmax + 2) * C * 4 + 2 * K * (C + 2) * 2 + (1 << 16)
    per_row = Wmax * (K * 6 + (C + 1) * 4 + out_pad * 8 + C * 8)
    cap = max(1, (budget_bytes - resident) // per_row)
    return int(min(Hmax, cap))


# ---------------------------------------------------------------------------
# Pallas kernels
# ---------------------------------------------------------------------------

def _fused_levels_kernel(xp_ref, wconv_ref, bconv_ref, wout_ref, bout_ref, o_ref,
                         *, TH, W, C, GROUP, np2, out_pad):
    """Fused per-(level, batch, row-tile) head.

    xp_ref:    (1, 1, Hpad+2, W+2, C)  padded NHWC frame (resident across row tiles)
    wconv_ref: (1, 3*GROUP, C+1)       vreg-aligned im2col weights per level
                                       [offset_conv hid (C) | objectness conv (1, BN folded)], bf16
    bconv_ref: (1, 1, C+1)             f32 biases
    wout_ref:  (C, 2*num_points)       offset_out 1x1 conv, bf16
    bout_ref:  (1, 2*num_points)       f32
    o_ref:     (1, 1, TH*W, out_pad)   lane-dense packed output:
               col 0 = sigmoid(objectness), cols 1..np2 = tanh(offset), rest zero
    """
    row0 = pl.multiple_of(pl.program_id(2) * TH, TH)
    xs = xp_ref[0, 0, pl.ds(row0, TH + 2), :, :]                 # (TH+2, W+2, C) f32
    gpad = GROUP - 3 * C
    zpad = jnp.zeros((TH, W, gpad), xs.dtype) if gpad else None
    groups = []
    for dy in range(3):                                          # dy strips: major-dim views
        strip = xs[dy:dy + TH]                                   # (TH, W+2, C)
        taps = [strip[:, dx:dx + W, :] for dx in range(3)]       # dx shifts, lane concat
        if gpad:
            taps.append(zpad)                                    # pad group to 128 lanes
        groups.append(jnp.concatenate(taps, axis=-1))            # (TH, W, GROUP)
    patch = jnp.concatenate(groups, axis=-1).reshape(TH * W, 3 * GROUP)

    # Single im2col matmul (full MXU systolic depth), bf16 operands, f32 accumulation.
    y = jnp.dot(patch.astype(jnp.bfloat16), wconv_ref[0],
                preferred_element_type=jnp.float32) + bconv_ref[0]   # (TH*W, C+1)
    hid = jnp.maximum(y[:, :C], 0.0)                             # offset_conv + relu
    obj = jax.nn.sigmoid(y[:, C:C + 1])                          # obj conv + BN + sigmoid
    off = jnp.tanh(jnp.dot(hid.astype(jnp.bfloat16), wout_ref[...],
                           preferred_element_type=jnp.float32) + bout_ref[...])
    pad = jnp.zeros((TH * W, out_pad - 1 - np2), jnp.float32)
    o_ref[0, 0] = jnp.concatenate([obj, off, pad], axis=-1).astype(o_ref.dtype)


def fused_levels(features, w_comb, b_comb, w_out, b_out, num_points, *, row_tile=None):
    """Runs all FPN levels in one pallas_call.

    Returns a list (per level) of (objectness (N, H*W), offsets (N, H*W, 2*num_points)),
    flattened row-major (h*W + w) to match the PyTorch reference.
    """
    nlvl = len(features)
    N, C = features[0].shape[0], features[0].shape[1]
    assert all(f.shape[1] == C for f in features)
    Hmax = max(int(f.shape[2]) for f in features)
    Wmax = max(int(f.shape[3]) for f in features)
    np2 = 2 * num_points
    out_pad = _round_up(1 + np2, 128)
    GROUP = _round_up(3 * C, 128)
    K = 3 * GROUP

    vmem_limit, vmem_budget = _tpu_vmem_budget()
    TH = int(row_tile) if row_tile else _choose_row_tile(Hmax, Wmax, C, K, out_pad, vmem_budget)
    TH = max(1, TH)
    while (TH * Wmax) % 8 != 0:          # output block second-minor dim must be 8-aligned
        TH += 1
    Hpad = _round_up(Hmax, TH)
    n_rt = Hpad // TH

    # Pack every level into a common zero-padded frame (zero fill == conv zero padding,
    # so valid pixels are exact; padded pixels are sliced away below).
    frames = []
    for f in features:
        H, W = int(f.shape[2]), int(f.shape[3])
        x = jnp.transpose(f, (0, 2, 3, 1))                       # NHWC
        x = jnp.pad(x, ((0, 0), (1, 1 + Hpad - H), (1, 1 + Wmax - W), (0, 0)))
        frames.append(x)
    xp = jnp.stack(frames, axis=0)                               # (nlvl, N, Hpad+2, Wmax+2, C)

    kern = functools.partial(_fused_levels_kernel, TH=TH, W=Wmax, C=C,
                             GROUP=GROUP, np2=np2, out_pad=out_pad)
    out = pl.pallas_call(
        kern,
        out_shape=jax.ShapeDtypeStruct((nlvl, N, Hpad * Wmax, out_pad), jnp.float32),
        grid=(nlvl, N, n_rt),
        in_specs=[
            pl.BlockSpec((1, 1, Hpad + 2, Wmax + 2, C), lambda l, n, r: (l, n, 0, 0, 0)),
            pl.BlockSpec((1, K, C + 1), lambda l, n, r: (l, 0, 0)),
            pl.BlockSpec((1, 1, C + 1), lambda l, n, r: (l, 0, 0)),
            pl.BlockSpec((C, np2), lambda l, n, r: (0, 0)),
            pl.BlockSpec((1, np2), lambda l, n, r: (0, 0)),
        ],
        out_specs=pl.BlockSpec((1, 1, TH * Wmax, out_pad), lambda l, n, r: (l, n, r, 0)),
        compiler_params=pltpu.CompilerParams(
            dimension_semantics=("parallel", "parallel", "arbitrary"),
            vmem_limit_bytes=vmem_limit),
    )(xp, w_comb, b_comb, w_out, b_out.reshape(1, -1))

    results = []
    for i, f in enumerate(features):
        H, W = int(f.shape[2]), int(f.shape[3])
        o = out[i].reshape(N, Hpad, Wmax, out_pad)[:, :H, :W, :]     # drop padded rows/cols
        results.append((o[..., 0].reshape(N, H * W),
                        o[..., 1:1 + np2].reshape(N, H * W, np2)))
    return results


def _predict_head_kernel(x_ref, w1_ref, w2_ref, wcb_ref, bcb_ref,
                         wb2_ref, bb2_ref, wb3_ref, bb3_ref, o_ref, *, nc, d, out_pad):
    """Fused PredictHead: combine_fcs (no bias, as in the reference) -> fused
    [class_embed | bbox fc1] matmul -> rest of bbox MLP + sigmoid.
    Output packed lane-dense: cols [0:nc]=cls, [nc:nc+4]=box, rest zero."""
    x = x_ref[...]                                                       # bf16
    h = jnp.maximum(jnp.dot(x, w1_ref[...], preferred_element_type=jnp.float32), 0.0)
    h = jnp.maximum(jnp.dot(h.astype(jnp.bfloat16), w2_ref[...],
                            preferred_element_type=jnp.float32), 0.0)
    cb = jnp.dot(h.astype(jnp.bfloat16), wcb_ref[...],
                 preferred_element_type=jnp.float32) + bcb_ref[...]      # (rows, nc+d)
    cls = cb[:, :nc]
    b = jnp.maximum(cb[:, nc:nc + d], 0.0)
    b = jnp.maximum(jnp.dot(b.astype(jnp.bfloat16), wb2_ref[...],
                            preferred_element_type=jnp.float32) + bb2_ref[...], 0.0)
    b = jax.nn.sigmoid(jnp.dot(b.astype(jnp.bfloat16), wb3_ref[...],
                               preferred_element_type=jnp.float32) + bb3_ref[...])
    pad = jnp.zeros((x.shape[0], out_pad - nc - 4), jnp.float32)
    o_ref[...] = jnp.concatenate([cls, b, pad], axis=-1).astype(o_ref.dtype)


def predict_head(x2d, p):
    M, Din = x2d.shape
    d = p["fc2_w"].shape[1]
    nc = p["cb_w"].shape[1] - d
    out_pad = _round_up(nc + 4, 128)
    # Row-block split only pays when each half is non-trivial MXU work (and only helps on
    # 2-TC parts like v7x); on a 1-TC chip the grid is a serial loop, so keep grid=(1,) for small M.
    rb = M // 2 if (M >= 256 and M % 2 == 0 and (M // 2) % 8 == 0) else M
    full = lambda i: (0, 0)
    kern = functools.partial(_predict_head_kernel, nc=nc, d=d, out_pad=out_pad)
    out = pl.pallas_call(
        kern,
        out_shape=jax.ShapeDtypeStruct((M, out_pad), jnp.float32),
        grid=(M // rb,),
        in_specs=[
            pl.BlockSpec((rb, Din), lambda i: (i, 0)),
            pl.BlockSpec(p["fc1_w"].shape, full),
            pl.BlockSpec(p["fc2_w"].shape, full),
            pl.BlockSpec(p["cb_w"].shape, full),
            pl.BlockSpec((1, nc + d), full),
            pl.BlockSpec(p["bbox_w2"].shape, full),
            pl.BlockSpec((1, d), full),
            pl.BlockSpec(p["bbox_w3"].shape, full),
            pl.BlockSpec((1, 4), full),
        ],
        out_specs=pl.BlockSpec((rb, out_pad), lambda i: (i, 0)),
        compiler_params=pltpu.CompilerParams(dimension_semantics=("parallel",)),
    )(x2d.astype(jnp.bfloat16),
      p["fc1_w"], p["fc2_w"],
      p["cb_w"], p["cb_b"].reshape(1, -1),
      p["bbox_w2"], p["bbox_b2"].reshape(1, -1),
      p["bbox_w3"], p["bbox_b3"].reshape(1, -1))
    return out[:, :nc], out[:, nc:nc + 4]


# ---------------------------------------------------------------------------
# Plain-JAX glue: bilinear sampling (grid_sample semantics) & analytic sine pos enc
# ---------------------------------------------------------------------------

def _bilinear_params(grid, H, W):
    """F.grid_sample(..., mode='bilinear', padding_mode='border', align_corners=False)
    corner indices + weights.  grid[..., 0] is x (width), grid[..., 1] is y (height) —
    the same convention F.grid_sample uses, so feeding it the reference's
    (row/H, col/W)-ordered points reproduces the reference exactly."""
    gx, gy = grid[..., 0], grid[..., 1]
    ix = jnp.clip(((gx + 1.0) * W - 1.0) / 2.0, 0.0, W - 1.0)
    iy = jnp.clip(((gy + 1.0) * H - 1.0) / 2.0, 0.0, H - 1.0)
    x0 = jnp.floor(ix)
    y0 = jnp.floor(iy)
    x1 = jnp.minimum(x0 + 1.0, W - 1.0)
    y1 = jnp.minimum(y0 + 1.0, H - 1.0)
    wx1 = ix - x0
    wx0 = 1.0 - wx1
    wy1 = iy - y0
    wy0 = 1.0 - wy1
    return (x0.astype(jnp.int32), x1.astype(jnp.int32),
            y0.astype(jnp.int32), y1.astype(jnp.int32), wx0, wx1, wy0, wy1)


def _gather_corners_channel_last(feat_nchw, yi, xi):
    N, C, H, W = feat_nchw.shape
    k, npnt = yi.shape[1], yi.shape[2]
    flat = feat_nchw.reshape(N, C, H * W)
    idx = (yi * W + xi).reshape(N, 1, k * npnt)
    g = jnp.take_along_axis(flat, jnp.broadcast_to(idx, (N, C, k * npnt)), axis=2)
    return jnp.transpose(g.reshape(N, C, k, npnt), (0, 2, 3, 1))     # (N, k, np, C)


def sample_feature_bilinear(feat, bl):
    x0i, x1i, y0i, y1i, wx0, wx1, wy0, wy1 = bl

    def w(a, b):
        return (a * b)[..., None]

    return (_gather_corners_channel_last(feat, y0i, x0i) * w(wy0, wx0) +
            _gather_corners_channel_last(feat, y0i, x1i) * w(wy0, wx1) +
            _gather_corners_channel_last(feat, y1i, x0i) * w(wy1, wx0) +
            _gather_corners_channel_last(feat, y1i, x1i) * w(wy1, wx1))


def _pos_sine_at(yi, xi, H, W, num_pos_feats, temperature=10000.0):
    """DETR PositionEmbeddingSine (normalize=True) evaluated at integer pixels (yi, xi).
    Returns channel-last (..., 2*num_pos_feats) with [pos_y | pos_x] ordering —
    identical to the full-map value at that pixel."""
    eps, scale = 1e-6, 2.0 * math.pi
    y_embed = (yi.astype(jnp.float32) + 1.0) / (float(H) + eps) * scale
    x_embed = (xi.astype(jnp.float32) + 1.0) / (float(W) + eps) * scale
    dim_t = jnp.arange(num_pos_feats, dtype=jnp.float32)
    dim_t = temperature ** (2.0 * jnp.floor(dim_t / 2.0) / num_pos_feats)
    px = x_embed[..., None] / dim_t
    py = y_embed[..., None] / dim_t
    shp = yi.shape
    px = jnp.stack([jnp.sin(px[..., 0::2]), jnp.cos(px[..., 1::2])], axis=-1).reshape(*shp, num_pos_feats)
    py = jnp.stack([jnp.sin(py[..., 0::2]), jnp.cos(py[..., 1::2])], axis=-1).reshape(*shp, num_pos_feats)
    return jnp.concatenate([py, px], axis=-1)


def sample_pos_bilinear(bl, H, W, num_pos_feats):
    x0i, x1i, y0i, y1i, wx0, wx1, wy0, wy1 = bl

    def w(a, b):
        return (a * b)[..., None]

    return (_pos_sine_at(y0i, x0i, H, W, num_pos_feats) * w(wy0, wx0) +
            _pos_sine_at(y0i, x1i, H, W, num_pos_feats) * w(wy0, wx1) +
            _pos_sine_at(y1i, x0i, H, W, num_pos_feats) * w(wy1, wx0) +
            _pos_sine_at(y1i, x1i, H, W, num_pos_feats) * w(wy1, wx1))


def box_cxcywh_to_xyxy(b):
    cx, cy, w, h = b[..., 0], b[..., 1], b[..., 2], b[..., 3]
    return jnp.stack([cx - 0.5 * w, cy - 0.5 * h, cx + 0.5 * w, cy + 0.5 * h], axis=-1)


# ---------------------------------------------------------------------------
# Parameter init (deterministic, synthetic — xavier-uniform weights, zero biases)
# ---------------------------------------------------------------------------

def _xavier(key, shape, fan_in, fan_out):
    bound = math.sqrt(6.0 / (fan_in + fan_out))
    return jax.random.uniform(key, shape, jnp.float32, -bound, bound)


def _conv_w_to_aligned(w, group):
    """(Cout, Cin, 3, 3) -> (3*group, Cout).  Row index = dy*group + dx*Cin + cin;
    rows [3*Cin, group) of each dy group are zero (vreg-aligned tap-group packing)."""
    cout, cin = w.shape[0], w.shape[1]
    t = jnp.transpose(w, (2, 3, 1, 0)).reshape(3, 3 * cin, cout)     # (ky, kx*cin, cout)
    t = jnp.pad(t, ((0, 0), (0, group - 3 * cin), (0, 0)))
    return t.reshape(3 * group, cout)


def init_params(key, *, d_feat, num_points, num_classes, level_channels):
    nlvl = len(level_channels)
    ks = jax.random.split(key, 16 + nlvl)
    GROUP = _round_up(3 * d_feat, 128)

    # Shared offset_conv 3x3 (d_feat -> d_feat)
    w_off = _xavier(ks[nlvl], (d_feat, d_feat, 3, 3), d_feat * 9, d_feat * 9)
    off_al = _conv_w_to_aligned(w_off, GROUP)                         # (3*GROUP, d_feat)
    off_b = jnp.zeros((d_feat,), jnp.float32)

    # Per-level fused conv weights: [offset_conv hid (d_feat) | objectness (1)].
    # ObjectnessHead BatchNorm2d(1) folded in eval mode (synthetic: mean=0, var=1, gamma=1, beta=0).
    bn_gamma, bn_beta, bn_mean, bn_var, bn_eps = 1.0, 0.0, 0.0, 1.0, 1e-5
    bn_scale = bn_gamma / math.sqrt(bn_var + bn_eps)
    ws, bs = [], []
    for i, c in enumerate(level_channels):
        assert c == d_feat, "fused level kernel assumes feature channels == HIDDEN_DIM"
        w_obj = _xavier(ks[i], (1, c, 3, 3), c * 9, 1 * 9)
        obj_al = _conv_w_to_aligned(w_obj, GROUP) * bn_scale
        b_obj = (0.0 - bn_mean) * bn_scale + bn_beta                  # conv bias = 0 (synthetic)
        ws.append(jnp.concatenate([off_al, obj_al], axis=1))          # (3*GROUP, C+1)
        bs.append(jnp.concatenate([off_b, jnp.full((1,), b_obj, jnp.float32)])[None, :])
    params = {
        "level_w": jnp.stack(ws).astype(jnp.bfloat16),                # (nlvl, 3*GROUP, C+1)
        "level_b": jnp.stack(bs),                                     # (nlvl, 1, C+1) f32
    }

    # offset_out 1x1 (d_feat -> 2*num_points)
    pts_out = 2 * num_points
    w = _xavier(ks[nlvl + 1], (pts_out, d_feat, 1, 1), d_feat, pts_out)
    params["offset_out_w"] = w[:, :, 0, 0].T.astype(jnp.bfloat16)
    params["offset_out_b"] = jnp.zeros((pts_out,), jnp.float32)

    # PredictHead.  combine_fcs are bias-free in the reference (nn.Linear(..., False)).
    d_comb = num_points * 2 * d_feat
    k = nlvl + 2
    class_w = _xavier(ks[k + 2], (d_feat, num_classes), d_feat, num_classes)
    bbox_w1 = _xavier(ks[k + 3], (d_feat, d_feat), d_feat, d_feat)
    params["predict"] = {
        "fc1_w": _xavier(ks[k], (d_comb, d_feat), d_comb, d_feat).astype(jnp.bfloat16),
        "fc2_w": _xavier(ks[k + 1], (d_feat, d_feat), d_feat, d_feat).astype(jnp.bfloat16),
        # class_embed and bbox-MLP fc1 fused horizontally (single MXU pass on shared h).
        "cb_w": jnp.concatenate([class_w, bbox_w1], axis=1).astype(jnp.bfloat16),
        "cb_b": jnp.zeros((num_classes + d_feat,), jnp.float32),
        "bbox_w2": _xavier(ks[k + 4], (d_feat, d_feat), d_feat, d_feat).astype(jnp.bfloat16),
        "bbox_b2": jnp.zeros((d_feat,), jnp.float32),
        "bbox_w3": _xavier(ks[k + 5], (d_feat, 4), d_feat, 4).astype(jnp.bfloat16),
        "bbox_b3": jnp.zeros((4,), jnp.float32),
    }
    return params


# ---------------------------------------------------------------------------
# Forward pass (SparseRepPointsHead, REFINE=False, DELTA_XY=True)
# ---------------------------------------------------------------------------

def sparse_reppoints_head_forward(features, params, *, top_k, num_points, d_feat, row_tile=None):
    N = features[0].shape[0]

    # One fused Pallas kernel for every level (objectness + offsets).
    level_outs = fused_levels(features, params["level_w"], params["level_b"],
                              params["offset_out_w"], params["offset_out_b"],
                              num_points, row_tile=row_tile)

    center_objectness, topk_xys, point_feats, position_feats = [], [], [], []
    for i, x in enumerate(features):
        _, C, H, W = x.shape
        p, offset = level_outs[i]
        center_objectness.append(p.reshape(N, H, W))

        # get_xy: top-k over flattened spatial, xy = (row/H, col/W)  [matches reference ordering]
        _, indices = jax.lax.top_k(p, top_k)
        xy = jnp.stack([(indices // W).astype(jnp.float32) / float(H),
                        (indices % W).astype(jnp.float32) / float(W)], axis=-1)
        topk_xys.append(xy)

        # sample_feat: gather offsets at top-k locations, build the sampling grid
        idx = jnp.broadcast_to(indices[:, :, None], (N, top_k, 2 * num_points))
        topk_offset = jnp.take_along_axis(offset, idx, axis=1)          # (N, k, 2*np)
        topk_points = topk_offset.reshape(N, top_k, num_points, 2) + xy[:, :, None, :]
        grid = 2.0 * topk_points - 1.0

        bl = _bilinear_params(grid, H, W)
        topk_feat = sample_feature_bilinear(x, bl)                      # (N, k, np, C)
        topk_pos = sample_pos_bilinear(bl, H, W, d_feat // 2)           # (N, k, np, d_feat)

        point_feats.append(topk_feat)
        position_feats.append(topk_pos)

    point_feats = jnp.concatenate(point_feats, axis=1)       # (N, num_obj, np, d_feat)
    position_feats = jnp.concatenate(position_feats, axis=1)
    init_xys = jnp.concatenate(topk_xys, axis=1)             # (N, num_obj, 2)

    b, num_obj, npnt, df = point_feats.shape
    pf = point_feats.reshape(b, num_obj, npnt * df)
    sf = position_feats.reshape(b, num_obj, npnt * df)
    xcomb = jnp.concatenate([pf, sf], axis=-1).reshape(b * num_obj, 2 * npnt * df)

    cls, box = predict_head(xcomb, params["predict"])
    cls = cls.reshape(b, num_obj, -1)
    box = box.reshape(b, num_obj, 4)

    # DELTA_XY=True: add init xys to (cx, cy) after sigmoid, before xyxy conversion
    box = box.at[:, :, :2].add(init_xys)
    box = box_cxcywh_to_xyxy(box)

    return cls[None], box[None], center_objectness


# ---------------------------------------------------------------------------
# Main
# ---------------------------------------------------------------------------

if __name__ == "__main__":
    # Synthetic config:
    #   HIDDEN_DIM=32, NUM_POINTS=9, TOP_K=8, NUM_CLASSES=4, USE_FOCAL=True,
    #   IN_FEATURES has 2 levels, REFINE=False, DELTA_XY=True.
    N, D_FEAT, NUM_POINTS, TOP_K, NUM_CLASSES = 2, 32, 9, 8, 4
    level_shapes = [(N, D_FEAT, 16, 16), (N, D_FEAT, 8, 8)]

    key = jax.random.PRNGKey(0)
    kfeat, kparam = jax.random.split(key)
    fkeys = jax.random.split(kfeat, len(level_shapes))
    features = [jax.random.normal(fk, s, jnp.float32) for fk, s in zip(fkeys, level_shapes)]

    params = init_params(kparam, d_feat=D_FEAT, num_points=NUM_POINTS,
                         num_classes=NUM_CLASSES,
                         level_channels=[s[1] for s in level_shapes])

    # row_tile=8 forces the multi-row-tile path (2 tiles on the 16-row frame) so it gets exercised.
    class_logits, pred_bboxes, center_obj = sparse_reppoints_head_forward(
        features, params, top_k=TOP_K, num_points=NUM_POINTS, d_feat=D_FEAT, row_tile=8)

    jax.block_until_ready(class_logits)
    jax.block_until_ready(pred_bboxes)
    for c in center_obj:
        jax.block_until_ready(c)

    assert class_logits.shape == (1, N, len(level_shapes) * TOP_K, NUM_CLASSES)
    assert pred_bboxes.shape == (1, N, len(level_shapes) * TOP_K, 4)
    assert center_obj[0].shape == (N, 16, 16) and center_obj[1].shape == (N, 8, 8)
    assert bool(jnp.all(jnp.isfinite(pred_bboxes)))
    print("KERNEL_OK")
</pallas_src>

<mosaic_0001>
module attributes {stable_mosaic.version = 11 : i64} {
  func.func @_fused_levels_kernel(%arg0: i32, %arg1: i32, %arg2: i32, %arg3: memref<1x1x18x18x32xf32, #tpu.memory_space<vmem>>, %arg4: memref<1x384x33xbf16, #tpu.memory_space<vmem>>, %arg5: memref<1x1x33xf32, #tpu.memory_space<vmem>>, %arg6: memref<32x18xbf16, #tpu.memory_space<vmem>>, %arg7: memref<1x18xf32, #tpu.memory_space<vmem>>, %arg8: memref<1x1x128x128xf32, #tpu.memory_space<vmem>>) attributes {dimension_semantics = [#tpu.dimension_semantics<parallel>, #tpu.dimension_semantics<parallel>, #tpu.dimension_semantics<arbitrary>], iteration_bounds = array<i64: 2, 2, 2>, scalar_prefetch = 0 : i64, scratch_operands = 0 : i64, tpu.core_type = #tpu.core_type<tc>, window_params = [{transform_indices = @transform_0, window_bounds = array<i64: 1, 1, 18, 18, 32>}, {transform_indices = @transform_1, window_bounds = array<i64: 1, 384, 33>}, {transform_indices = @transform_2, window_bounds = array<i64: 1, 1, 33>}, {pipeline_mode = #tpu.pipeline_mode<synchronous>, transform_indices = @transform_3, window_bounds = array<i64: 32, 18>}, {pipeline_mode = #tpu.pipeline_mode<synchronous>, transform_indices = @transform_4, window_bounds = array<i64: 1, 18>}, {transform_indices = @transform_5, window_bounds = array<i64: 1, 1, 128, 128>}]} {
    %c8_i32 = arith.constant 8 : i32
    %0 = arith.muli %arg2, %c8_i32 : i32
    %1 = tpu.assume_multiple %0, 8 : i32
    %c0 = arith.constant 0 : index
    %c0_0 = arith.constant 0 : index
    %2 = arith.index_cast %1 : i32 to index
    %c0_1 = arith.constant 0 : index
    %c0_2 = arith.constant 0 : index
    %3 = vector.load %arg3[%c0, %c0_0, %2, %c0_1, %c0_2] : memref<1x1x18x18x32xf32, #tpu.memory_space<vmem>>, vector<1x1x10x18x32xf32>
    %4 = vector.shape_cast %3 : vector<1x1x10x18x32xf32> to vector<10x18x32xf32>
    %cst = arith.constant 0.000000e+00 : f32
    %5 = vector.broadcast %cst : f32 to vector<8x16x32xf32>
    %6 = vector.extract_strided_slice %4 {offsets = [0, 0, 0], sizes = [8, 18, 32], strides = [1, 1, 1]} : vector<10x18x32xf32> to vector<8x18x32xf32>
    %7 = vector.extract_strided_slice %6 {offsets = [0, 0, 0], sizes = [8, 16, 32], strides = [1, 1, 1]} : vector<8x18x32xf32> to vector<8x16x32xf32>
    %8 = vector.extract_strided_slice %6 {offsets = [0, 1, 0], sizes = [8, 16, 32], strides = [1, 1, 1]} : vector<8x18x32xf32> to vector<8x16x32xf32>
    %9 = vector.extract_strided_slice %6 {offsets = [0, 2, 0], sizes = [8, 16, 32], strides = [1, 1, 1]} : vector<8x18x32xf32> to vector<8x16x32xf32>
    %10 = tpu.concatenate %7, %8, %9, %5 in 2 : vector<8x16x32xf32>, vector<8x16x32xf32>, vector<8x16x32xf32>, vector<8x16x32xf32> -> vector<8x16x128xf32>
    %11 = vector.extract_strided_slice %4 {offsets = [1, 0, 0], sizes = [8, 18, 32], strides = [1, 1, 1]} : vector<10x18x32xf32> to vector<8x18x32xf32>
    %12 = vector.extract_strided_slice %11 {offsets = [0, 0, 0], sizes = [8, 16, 32], strides = [1, 1, 1]} : vector<8x18x32xf32> to vector<8x16x32xf32>
    %13 = vector.extract_strided_slice %11 {offsets = [0, 1, 0], sizes = [8, 16, 32], strides = [1, 1, 1]} : vector<8x18x32xf32> to vector<8x16x32xf32>
    %14 = vector.extract_strided_slice %11 {offsets = [0, 2, 0], sizes = [8, 16, 32], strides = [1, 1, 1]} : vector<8x18x32xf32> to vector<8x16x32xf32>
    %15 = tpu.concatenate %12, %13, %14, %5 in 2 : vector<8x16x32xf32>, vector<8x16x32xf32>, vector<8x16x32xf32>, vector<8x16x32xf32> -> vector<8x16x128xf32>
    %16 = vector.extract_strided_slice %4 {offsets = [2, 0, 0], sizes = [8, 18, 32], strides = [1, 1, 1]} : vector<10x18x32xf32> to vector<8x18x32xf32>
    %17 = vector.extract_strided_slice %16 {offsets = [0, 0, 0], sizes = [8, 16, 32], strides = [1, 1, 1]} : vector<8x18x32xf32> to vector<8x16x32xf32>
    %18 = vector.extract_strided_slice %16 {offsets = [0, 1, 0], sizes = [8, 16, 32], strides = [1, 1, 1]} : vector<8x18x32xf32> to vector<8x16x32xf32>
    %19 = vector.extract_strided_slice %16 {offsets = [0, 2, 0], sizes = [8, 16, 32], strides = [1, 1, 1]} : vector<8x18x32xf32> to vector<8x16x32xf32>
    %20 = tpu.concatenate %17, %18, %19, %5 in 2 : vector<8x16x32xf32>, vector<8x16x32xf32>, vector<8x16x32xf32>, vector<8x16x32xf32> -> vector<8x16x128xf32>
    %21 = tpu.concatenate %10, %15, %20 in 2 : vector<8x16x128xf32>, vector<8x16x128xf32>, vector<8x16x128xf32> -> vector<8x16x384xf32>
    %22 = vector.shape_cast %21 : vector<8x16x384xf32> to vector<128x384xf32>
    %23 = arith.truncf %22 : vector<128x384xf32> to vector<128x384xbf16>
    %c0_3 = arith.constant 0 : index
    %c0_4 = arith.constant 0 : index
    %c0_5 = arith.constant 0 : index
    %24 = vector.load %arg4[%c0_3, %c0_4, %c0_5] : memref<1x384x33xbf16, #tpu.memory_space<vmem>>, vector<1x384x33xbf16>
    %25 = vector.shape_cast %24 : vector<1x384x33xbf16> to vector<384x33xbf16>
    %cst_6 = arith.constant dense<0.000000e+00> : vector<128x33xf32>
    %26 = tpu.matmul %23, %25, %cst_6 {dimension_numbers = #tpu.dot_dimension_numbers<[1], [0], [0], [1], [0, 0, 1, 1], [], []>} : vector<128x384xbf16>, vector<384x33xbf16>, vector<128x33xf32> -> vector<128x33xf32>
    %c0_7 = arith.constant 0 : index
    %c0_8 = arith.constant 0 : index
    %c0_9 = arith.constant 0 : index
    %27 = vector.load %arg5[%c0_7, %c0_8, %c0_9] : memref<1x1x33xf32, #tpu.memory_space<vmem>>, vector<1x1x33xf32>
    %28 = vector.shape_cast %27 : vector<1x1x33xf32> to vector<1x33xf32>
    %29 = vector.broadcast %28 : vector<1x33xf32> to vector<128x33xf32>
    %30 = arith.addf %26, %29 : vector<128x33xf32>
    %31 = vector.extract_strided_slice %30 {offsets = [0, 0], sizes = [128, 32], strides = [1, 1]} : vector<128x33xf32> to vector<128x32xf32>
    %cst_10 = arith.constant 0.000000e+00 : f32
    %32 = vector.broadcast %cst_10 : f32 to vector<128x32xf32>
    %33 = arith.maximumf %31, %32 : vector<128x32xf32>
    %34 = vector.extract_strided_slice %30 {offsets = [0, 32], sizes = [128, 1], strides = [1, 1]} : vector<128x33xf32> to vector<128x1xf32>
    %35 = arith.negf %34 : vector<128x1xf32>
    %36 = math.exp %35 : vector<128x1xf32>
    %cst_11 = arith.constant 1.000000e+00 : f32
    %37 = vector.broadcast %cst_11 : f32 to vector<128x1xf32>
    %38 = arith.addf %37, %36 : vector<128x1xf32>
    %39 = arith.divf %37, %38 : vector<128x1xf32>
    %40 = arith.truncf %33 : vector<128x32xf32> to vector<128x32xbf16>
    %c0_12 = arith.constant 0 : index
    %c0_13 = arith.constant 0 : index
    %41 = vector.load %arg6[%c0_12, %c0_13] : memref<32x18xbf16, #tpu.memory_space<vmem>>, vector<32x18xbf16>
    %cst_14 = arith.constant dense<0.000000e+00> : vector<128x18xf32>
    %42 = tpu.matmul %40, %41, %cst_14 {dimension_numbers = #tpu.dot_dimension_numbers<[1], [0], [0], [1], [0, 0, 1, 1], [], []>} : vector<128x32xbf16>, vector<32x18xbf16>, vector<128x18xf32> -> vector<128x18xf32>
    %c0_15 = arith.constant 0 : index
    %c0_16 = arith.constant 0 : index
    %43 = vector.load %arg7[%c0_15, %c0_16] : memref<1x18xf32, #tpu.memory_space<vmem>>, vector<1x18xf32>
    %44 = vector.broadcast %43 : vector<1x18xf32> to vector<128x18xf32>
    %45 = arith.addf %42, %44 : vector<128x18xf32>
    %46 = math.tanh %45 : vector<128x18xf32>
    %cst_17 = arith.constant 0.000000e+00 : f32
    %47 = vector.broadcast %cst_17 : f32 to vector<128x109xf32>
    %48 = tpu.concatenate %39, %46, %47 in 1 : vector<128x1xf32>, vector<128x18xf32>, vector<128x109xf32> -> vector<128x128xf32>
    %c0_18 = arith.constant 0 : index
    %c0_19 = arith.constant 0 : index
    %c0_20 = arith.constant 0 : index
    %c0_21 = arith.constant 0 : index
    %49 = vector.load %arg8[%c0_18, %c0_19, %c0_20, %c0_21] : memref<1x1x128x128xf32, #tpu.memory_space<vmem>>, vector<1x1x128x128xf32>
    %50 = vector.shape_cast %49 : vector<1x1x128x128xf32> to vector<128x128xf32>
    %51 = vector.shape_cast %48 : vector<128x128xf32> to vector<1x1x128x128xf32>
    tpu.vector_store %arg8[%c0_18, %c0_19, %c0_20, %c0_21], %51 {strides = array<i32>} : memref<1x1x128x128xf32, #tpu.memory_space<vmem>>, vector<1x1x128x128xf32>,
    return
  }
  func.func @transform_0(%arg0: i32, %arg1: i32, %arg2: i32) -> (i32, i32, i32, i32, i32) {
    %c0_i32 = arith.constant 0 : i32
    %c0_i32_0 = arith.constant 0 : i32
    %c0_i32_1 = arith.constant 0 : i32
    %c0_i32_2 = arith.constant 0 : i32
    return %arg0, %arg1, %c0_i32, %c0_i32_0, %c0_i32_1 : i32, i32, i32, i32, i32
  }
  func.func @transform_1(%arg0: i32, %arg1: i32, %arg2: i32) -> (i32, i32, i32) {
    %c0_i32 = arith.constant 0 : i32
    %c0_i32_0 = arith.constant 0 : i32
    %c0_i32_1 = arith.constant 0 : i32
    return %arg0, %c0_i32, %c0_i32_0 : i32, i32, i32
  }
  func.func @transform_2(%arg0: i32, %arg1: i32, %arg2: i32) -> (i32, i32, i32) {
    %c0_i32 = arith.constant 0 : i32
    %c0_i32_0 = arith.constant 0 : i32
    %c0_i32_1 = arith.constant 0 : i32
    return %arg0, %c0_i32, %c0_i32_0 : i32, i32, i32
  }
  func.func @transform_3(%arg0: i32, %arg1: i32, %arg2: i32) -> (i32, i32) {
    %c0_i32 = arith.constant 0 : i32
    %c0_i32_0 = arith.constant 0 : i32
    %c0_i32_1 = arith.constant 0 : i32
    return %c0_i32, %c0_i32_0 : i32, i32
  }
  func.func @transform_4(%arg0: i32, %arg1: i32, %arg2: i32) -> (i32, i32) {
    %c0_i32 = arith.constant 0 : i32
    %c0_i32_0 = arith.constant 0 : i32
    %c0_i32_1 = arith.constant 0 : i32
    return %c0_i32, %c0_i32_0 : i32, i32
  }
  func.func @transform_5(%arg0: i32, %arg1: i32, %arg2: i32) -> (i32, i32, i32, i32) {
    %c0_i32 = arith.constant 0 : i32
    %c0_i32_0 = arith.constant 0 : i32
    return %arg0, %arg1, %arg2, %c0_i32 : i32, i32, i32, i32
  }
}

</mosaic_0001>

<bundles_post_ra>
// kernel: tpu_custom_call.1
= control target key start
LH: loop header
LB: loop body
LE: loop exit
PB: predicated region body
PF: predicated region fallthrough
CT: control target
= control target key end

     0   :  { %10 = vsyncpa [#allocation3], 0  ;;  %s3061_s0 = inlined_call_operand.vmem [shape: f32[2,2,18,18,32], index: 0, kind: input, shape index: {}]   ;;  %s3062_s1 = inlined_call_operand.vmem [shape: bf16[2,384,33], index: 1, kind: input, shape index: {}]   ;;  %s3063_s2 = inlined_call_operand.vmem [shape: f32[2,1,33], index: 2, kind: input, shape index: {}]   ;;  %s3064_s3 = inlined_call_operand.vmem [shape: bf16[32,18], index: 3, kind: input, shape index: {}]   ;;  %s3065_s4 = inlined_call_operand.vmem [shape: f32[1,18], index: 4, kind: input, shape index: {}]   ;;  %s3066_s5 = inlined_call_operand.hbm [shape: f32[2,2,256,128], index: 5, kind: output, shape index: {}]  }
   0x1   :  { %12 = vsyncpa [#allocation3 + $0x1], 0  ;;  %s2389_s18 = smov 0   ;;  %s2391_s19 = smov 0  }
   0x2   :  { %s2393_s20 = smov 0   ;;  %s2395_s21 = smov 0  }
   0x3   :  { %s2397_s22 = smov 0   ;;  %s2399_s23 = smov 0  }
   0x4   :  { %s2401_s24 = smov 0   ;;  %s2403_s25 = smov 0  }
   0x5   :  { %s2405_s26 = smov 0   ;;  %s2407_s27 = smov 0  }
   0x6 LB: > { %3073 = sst [smem:[#allocation5_spill]] %s2338_s24  ;;  %s1639_s28 = sadd.s32 4294967295, %s2350_s27   ;;  %s2350_s27 = sphi %s2407_s27, %s18_s27   ;;  %s2346_s26 = sphi %s2405_s26, %s3088_s26   ;;  %s2342_s25 = sphi %s2403_s25, %s3087_s25   ;;  %s2338_s24 = sphi %s2401_s24, %s3086_s24   ;;  %s2334_s23 = sphi %s2399_s23, %s3085_s23   ;;  %s2330_s22 = sphi %s2397_s22, %s3084_s22   ;;  %s2326_s21 = sphi %s2395_s21, %s3083_s21   ;;  %s2322_s20 = sphi %s2393_s20, %s3091_s20   ;;  %s2318_s19 = sphi %s2391_s19, %s3090_s19   ;;  %s2314_s18 = sphi %s2389_s18, %s3089_s18  }
   0x7   : > { %3074 = sst [smem:[#allocation6_spill]] %s2342_s25  ;;  %s30_s29 = sadd.s32 1, %s2338_s24 }
   0x8   : > { %3075 = sst [smem:[#allocation7_spill]] %s2346_s26  ;;  %p31_p0 = scmp.ge.s32.totalorder %s30_s29, 2 }
   0x9   : > { %s33_s30 = sadd.s32 1, %s2342_s25  ;;  %s1640_s6 = sadd.s32 4294967294, %s2350_s27  }
   0xa   : > { %p180_p1 = scmp.ne.s32.totalorder %s2322_s20, %s2318_s19  ;;  %s3093_s29 = smov (%p31_p0, %s30_s29), 0 }
   0xb   : > { %3076 = sst [smem:[#allocation8_spill]] %s3093_s29  ;;  %s3095_s30 = smov (!%p31_p0, %s33_s30), %s2342_s25 }
   0xc   : > { %s37_s7 = sadd.s32 1, %s2346_s26  ;;  %p181_p2 = scmp.eq.s32.totalorder %s1639_s28, 7 }
   0xd   : > { %p35_p3 = scmp.ge.s32.totalorder %s3095_s30, 2  ;;  %p186_p4 = scmp.ne.s32.totalorder %s2318_s19, %s2314_s18 }
   0xe   : > { %p2451_p5 = por %p181_p2, %p180_p1  ;;  %p187_p6 = scmp.eq.s32.totalorder %s1640_s6, 7 }
   0xf   : > { %s3097_s30 = smov (%p35_p3, %s3095_s30), 0  ;;  %s3099_s7 = smov (!%p35_p3, %s37_s7), %s2346_s26 }
  0x10   : > { %3078 = sst [smem:[#allocation9_spill]] %s3097_s30  ;;  %p2458_p7 = por %p187_p6, %p186_p4 }
  0x11   : > { %p39_p8 = scmp.ge.s32.totalorder %s3099_s7, 2  ;;  %p1643_p9 = scmp.ge.s32.totalorder %s2350_s27, 1 }
  0x12   : > { %s164_s10 = ssub.s32 %s2342_s25, %s3097_s30  ;;  %p237_p10 = scmp.lt.s32.totalorder %s2350_s27, 9 }
  0x13   : > { %s3101_s7 = smov (%p39_p8, %s3099_s7), 0  ;;  %s166_s11 = ssub.s32 %s2338_s24, %s3093_s29 }
  0x14   : > { %3080 = sst [smem:[#allocation10_spill]] %s3101_s7  ;;  %p238_p11 = pnand %p1643_p9, %p237_p10 }
  0x15   : > { %s163_s12 = ssub.s32 %s2346_s26, %s3101_s7  ;;  %s170_s15 = sadd.s32 1, %s2322_s20  ;;  %vm353_vm0 = vcmask (!%p238_p11), 1046528   ;;  %vm442_vm1 = vcmask (!%p238_p11), 1045504   ;;  %vm531_vm2 = vcmask (!%p238_p11), 261120   ;;  %vm548_vm3 = vcmask (!%p238_p11), 523264  }
  0x16   : > { %s165_s13 = sor.u32 %s164_s10, %s163_s12  ;;  %241 = sbr.rel (%p238_p11) target bundleno = 814 (0x32e), region = 40  ;;  %vm565_vm4 = vcmask (!%p238_p11), 785408   ;;  %vm1455_vm6 = vcmask (!%p238_p11), 7168   ;;  %vm1472_vm7 = vcmask (!%p238_p11), 154624  }
  0x17   : > { %s167_s14 = sor.u32 %s166_s11, %s165_s13  ;;  %p277_p13 = scmp.lt.s32.totalorder (!%p238_p11), %s2334_s23, 1  ;;  %vm2707_vm5 = vmpackc.low (!%p238_p11), %vm565_vm4, %vm565_vm4 }
  0x18   : > { %p168_p12 = scmp.eq.s32.totalorder %s167_s14, 0  ;;  %p279_p0 = scmp.lt.s32.totalorder (!%p238_p11), %s2330_s22, 1 }
  0x19   : > { %s1648_s17 = smul.u32 (!%p238_p11), 192, %s2326_s21  ;;  %s2353_s26 = smov (!%p238_p11), 64  }
  0x1a   : > { %s2474_s16 = scalar_select %p168_p12, %s2322_s20, %s170_s15  }
  0x1d   : > { %s2480_s28 = scalar_select %p277_p13, %s2334_s23, 1 }
  0x1e   : > { %s280_s6 = scalar_select %p279_p0, %s2330_s22, 1 }
  0x1f   : > { %s1923_s10 = smul.u32 108, %s2480_s28 }
  0x20   : > { %s1922_s11 = smul.u32 54, %s280_s6 }
  0x21   : > { %s1924_s12 = smul.u32 192, %s2480_s28 }
  0x22   : > { %s283_s13 = sadd.s32 %s1923_s10, %s1922_s11  ;;  %s293_s10 = scalar_lea.vmem %s3063_s2, %s2480_s28 }
  0x23   : > { %s1645_s14 = sshll.u32 %s283_s13, 3  ;;  %s2488_s30 = scalar_lea.vmem %s3062_s1, %s1924_s12 }
  0x24   : > { %s285_s25 = scalar_lea.vmem %s3061_s0, %s1645_s14  ;;  %v2118_v0 = vld [vmem:[%s2488_s30 + $0x40] sm:$0xff]   ;;  %v2120_v59 = vld [vmem:[%s2488_s30 + $0x48] sm:$0xff]   ;;  %s2354_s28 = smov 96  }
  0x25   : > { %s2494_s24 = scalar_lea.vmem %s285_s25, %s1648_s17  ;;  %v2119_v1 = vld [vmem:[%s2488_s30] sm:$0xff]   ;;  %1780 = vmatprep.subr.bf16.mxu0 %v2118_v0  ;;  %s2352_s25 = smov 32  }
  0x26   : > { %v2498_v2 = vld [vmem:[%s2494_s24 + $0x18] sm:$0xff]  ;;  %v2501_v3 = vld [vmem:[%s2494_s24 + $0x20] sm:$0xff]  ;;  %v304_v4 = vld [vmem:[%s2494_s24 + $0x28] sm:$0x3]  ;;  %1781 = vmatpush3.bf16.msra.mxu0 %v2119_v1  ;;  %s2355_s13 = smov 1   ;;  %s274_s14 = sand.u32 1, %s2318_s19  }
  0x27   : > { %v359_v5 = vrot.slane %v2498_v2, 1  ;;  %v360_v6 = vrot.slane %v2501_v3, 1  ;;  %v362_v7 = vrot.slane %v304_v4, 1  ;;  %v448_v8 = vrot.slane %v2498_v2, 2  ;;  %v2508_v9 = vld [vmem:[%s2494_s24] sm:$0xff]  ;;  %v2511_v10 = vld [vmem:[%s2494_s24 + $0x8] sm:$0xff]  ;;  %1782 = vmatprep.subr.bf16.mxu0 %v2120_v59 }
  0x28   : > { %v449_v11 = vrot.slane %v2501_v3, 2  ;;  %v451_v12 = vrot.slane %v304_v4, 2  ;;  %v301_v13 = vld [vmem:[%s2494_s24 + $0x10] sm:$0x3]  ;;  %v354_v14 = vrot.slane %v2508_v9, 1  ;;  %v355_v15 = vrot.slane %v2511_v10, 1 }
  0x29   : > { %v361_v16 = vsel %vm353_vm0, %v359_v5, %v360_v6  ;;  %v363_v17 = vsel %vm353_vm0, %v360_v6, %v362_v7  ;;  %v357_v18 = vrot.slane %v301_v13, 1  ;;  %v443_v19 = vrot.slane %v2508_v9, 2  ;;  %v2521_v20 = vld [vmem:[%s2494_s24 + $0x30] sm:$0xff]  ;;  %v2524_v21 = vld [vmem:[%s2494_s24 + $0x38] sm:$0xff]  ;;  %v307_v22 = vld [vmem:[%s2494_s24 + $0x40] sm:$0x3] }
  0x2a   : > { %v2018_v23 = vpack.i.bf16 %v363_v17, %v361_v16  ;;  %v450_v24 = vsel %vm442_vm1, %v448_v8, %v449_v11  ;;  %v452_v25 = vsel %vm442_vm1, %v449_v11, %v451_v12  ;;  %v356_v26 = vsel %vm353_vm0, %v354_v14, %v355_v15  ;;  %v2536_v35 = vld [vmem:[%s2494_s24 + $0x48] sm:$0xff]  ;;  %v2539_v36 = vld [vmem:[%s2494_s24 + $0x50] sm:$0xff]  ;;  %v310_v41 = vld [vmem:[%s2494_s24 + $0x58] sm:$0x3]  ;;  %s1644_s15 = sshll.u32 %s274_s14, 7  ;;  %s2356_s11 = smov [#allocation2]  }
  0x2b   : > { %v2028_v27 = vpack.i.bf16 %v452_v25, %v450_v24  ;;  %v358_v28 = vsel %vm353_vm0, %v355_v15, %v357_v18  ;;  %v444_v29 = vrot.slane %v2511_v10, 2  ;;  %v446_v30 = vrot.slane %v301_v13, 2  ;;  %v2550_v46 = vld [vmem:[%s2494_s24 + $0x60] sm:$0xff]  ;;  %v2556_v51 = vld [vmem:[%s2494_s24 + $0x68] sm:$0xff]  ;;  %v313_v52 = vld [vmem:[%s2494_s24 + $0x70] sm:$0x3] }
  0x2c   : > { %2019 = vrot.lane.b32.xlu0 %v2018_v23, %s2352_s25  ;;  %v2023_v31 = vpack.i.bf16 %v358_v28, %v356_v26  ;;  %v364_v32 = vrot.slane %v2521_v20, 1  ;;  %v365_v33 = vrot.slane %v2524_v21, 1  ;;  %v367_v34 = vrot.slane %v307_v22, 1  ;;  %v2564_v57 = vld [vmem:[%s2494_s24 + $0x78] sm:$0xff]  ;;  %v2567_v58 = vld [vmem:[%s2494_s24 + $0x80] sm:$0xff]  ;;  %v2578_v7 = vld [vmem:[%s2494_s24 + $0x90] sm:$0xff] }
  0x2d   : > { %2029 = vrot.lane.b32.xlu1 %v2028_v27, %s2353_s26  ;;  %v445_v37 = vsel %vm442_vm1, %v443_v19, %v444_v29  ;;  %v447_v38 = vsel %vm442_vm1, %v444_v29, %v446_v30  ;;  %v453_v39 = vrot.slane %v2521_v20, 2  ;;  %v454_v40 = vrot.slane %v2524_v21, 2  ;;  %v316_v0 = vld [vmem:[%s2494_s24 + $0x88] sm:$0x3]  ;;  %v2584_v13 = vld [vmem:[%s2494_s24 + $0x98] sm:$0xff]  ;;  %v2122_v16 = vld [vmem:[%s2488_s30 + $0x50] sm:$0xff]  }
  0x2e   : > { %v2033_v42 = vpack.i.bf16 %v447_v38, %v445_v37  ;;  %v366_v43 = vsel %vm353_vm0, %v364_v32, %v365_v33  ;;  %v368_v44 = vsel %vm353_vm0, %v365_v33, %v367_v34  ;;  %v456_v45 = vrot.slane %v307_v22, 2  ;;  %v2587_v14 = vld [vmem:[%s2494_s24 + $0xa0] sm:$0x3]  ;;  %v2121_v15 = vld [vmem:[%s2488_s30 + $0x8] sm:$0xff]   ;;  %v2124_v32 = vld [vmem:[%s2488_s30 + $0x10] sm:$0xff]   ;;  %s2244_s12 = sshll.u32 %s2356_s11, 4  ;;  %s2245_s12 = int_to_ptr.vmem [resolvable:$false] %s2244_s12 }
  0x2f   : > { %v2038_v47 = vpack.i.bf16 %v368_v44, %v366_v43  ;;  %v455_v48 = vsel %vm442_vm1, %v453_v39, %v454_v40  ;;  %v369_v49 = vrot.slane %v2536_v35, 1  ;;  %v370_v50 = vrot.slane %v2539_v36, 1  ;;  %v2123_v23 = vld [vmem:[%s2488_s30 + $0x80] sm:$0xff]   ;;  %1783 = vmatpush3.bf16.msra.mxu0 %v2121_v15  ;;  %v2606_v39 = vld [vmem:[%s2494_s24 + $0xa8] sm:$0xff]  ;;  %v2127_v59 = vld [vmem:[%s2488_s30 + $0x18] sm:$0xff]  }
  0x30   : > { %2024 = vrot.lane.b32.xlu0 %v2023_v31, %s2352_s25  ;;  %v457_v53 = vsel %vm442_vm1, %v454_v40, %v456_v45  ;;  %v372_v54 = vrot.slane %v310_v41, 1  ;;  %v458_v55 = vrot.slane %v2536_v35, 2  ;;  %v459_v56 = vrot.slane %v2539_v36, 2  ;;  %1784 = vmatprep.subr.bf16.mxu0 %v2122_v16  ;;  %v2609_v40 = vld [vmem:[%s2494_s24 + $0xb0] sm:$0xff]  ;;  %v2647_v15 = vld [vmem:[%s2494_s24 + $0xd8] sm:$0xff]  ;;  %v2650_v16 = vld [vmem:[%s2494_s24 + $0xe0] sm:$0xff] }
  0x31   : > { %2034 = vrot.lane.b32.xlu1 %v2033_v42, %s2353_s26  ;;  %v2043_v60 = vpack.i.bf16 %v457_v53, %v455_v48  ;;  %v371_v61 = vsel %vm353_vm0, %v369_v49, %v370_v50  ;;  %v461_v62 = vrot.slane %v310_v41, 2  ;;  %v374_v63 = vrot.slane %v2550_v46, 1  ;;  %1870 = vmatprep.subr.bf16.mxu1 %v2123_v23  ;;  %v2612_v41 = vld [vmem:[%s2494_s24 + $0xb8] sm:$0x3]  ;;  %v2126_v48 = vld [vmem:[%s2488_s30 + $0x88] sm:$0xff]  }
  0x32   : > { %v373_v1 = vsel %vm353_vm0, %v370_v50, %v372_v54  ;;  %v460_v4 = vsel %vm442_vm1, %v458_v55, %v459_v56  ;;  %v375_v5 = vrot.slane %v2556_v51, 1  ;;  %v377_v6 = vrot.slane %v313_v52, 1  ;;  %1871 = vmatpush3.bf16.msra.mxu1 %v2123_v23  ;;  %v2626_v54 = vld [vmem:[%s2494_s24 + $0xc0] sm:$0xff] }
  0x33   : > { %v462_v8 = vsel %vm442_vm1, %v459_v56, %v461_v62  ;;  %v463_v11 = vrot.slane %v2550_v46, 2  ;;  %v464_v12 = vrot.slane %v2556_v51, 2  ;;  %v2048_v17 = vpack.i.bf16 %v373_v1, %v371_v61  ;;  %1785 = vmatpush3.bf16.msra.mxu0 %v2124_v32  ;;  %v2630_v56 = vld [vmem:[%s2494_s24 + $0xc8] sm:$0xff]  ;;  %1872 = vmatprep.subr.bf16.mxu1 %v2126_v48 }
  0x34   : > { %2039 = vrot.lane.b32.xlu0 %v2038_v47, %s2352_s25  ;;  %v376_v18 = vsel %vm353_vm0, %v374_v63, %v375_v5  ;;  %v378_v19 = vsel %vm353_vm0, %v375_v5, %v377_v6  ;;  %v466_v22 = vrot.slane %v313_v52, 2  ;;  %v2053_v24 = vpack.i.bf16 %v462_v8, %v460_v4  ;;  %v2125_v47 = vld [vmem:[%s2488_s30 + $0x58] sm:$0xff]   ;;  %v325_v63 = vld [vmem:[%s2494_s24 + $0xd0] sm:$0x3]  ;;  %v2128_v6 = vld [vmem:[%s2488_s30 + $0x60] sm:$0xff]  }
  0x35   : > { %2044 = vrot.lane.b32.xlu1 %v2043_v60, %s2353_s26  ;;  %v465_v25 = vsel %vm442_vm1, %v463_v11, %v464_v12  ;;  %v379_v26 = vrot.slane %v2564_v57, 1  ;;  %v380_v27 = vrot.slane %v2567_v58, 1  ;;  %v382_v29 = vrot.slane %v316_v0, 1  ;;  %1786 = vmatprep.subr.bf16.mxu0 %v2125_v47 }
  0x36   : > { %v467_v28 = vsel %vm442_vm1, %v464_v12, %v466_v22  ;;  %v468_v30 = vrot.slane %v2564_v57, 2  ;;  %v469_v31 = vrot.slane %v2567_v58, 2  ;;  %v2058_v33 = vpack.i.bf16 %v378_v19, %v376_v18  ;;  %1873 = vmatpush3.bf16.msra.mxu1 %v2126_v48  ;;  %v2129_v18 = vld [vmem:[%s2488_s30 + $0x90] sm:$0xff]   ;;  %v2130_v19 = vld [vmem:[%s2488_s30 + $0x20] sm:$0xff]  }
  0x37   : > { %v381_v34 = vsel %vm353_vm0, %v379_v26, %v380_v27  ;;  %v471_v37 = vrot.slane %v316_v0, 2  ;;  %v384_v38 = vrot.slane %v2578_v7, 1  ;;  %v383_v42 = vsel %vm353_vm0, %v380_v27, %v382_v29  ;;  %1787 = vmatpush3.bf16.msra.mxu0 %v2127_v59  ;;  %1874 = vmatprep.subr.bf16.mxu1 %v2129_v18  ;;  %v2135_v48 = vld [vmem:[%s2488_s30 + $0xa0] sm:$0xff]   ;;  %v2136_v59 = vld [vmem:[%s2488_s30 + $0x30] sm:$0xff]  }
  0x38   : > { %2049 = vrot.lane.b32.xlu0 %v2048_v17, %s2352_s25  ;;  %v470_v43 = vsel %vm442_vm1, %v468_v30, %v469_v31  ;;  %v385_v44 = vrot.slane %v2584_v13, 1  ;;  %v387_v45 = vrot.slane %v2587_v14, 1  ;;  %v2063_v49 = vpack.i.bf16 %v467_v28, %v465_v25  ;;  %v2653_v17 = vld [vmem:[%s2494_s24 + $0xe8] sm:$0x3]  ;;  %1788 = vmatprep.subr.bf16.mxu0 %v2128_v6  ;;  %s1775_s24 = sshll.u32 %s2330_s22, 5 }
  0x39   : > { %2054 = vrot.lane.b32.xlu1 %v2053_v24, %s2353_s26  ;;  %v472_v50 = vsel %vm442_vm1, %v469_v31, %v471_v37  ;;  %v473_v52 = vrot.slane %v2578_v7, 2  ;;  %v474_v53 = vrot.slane %v2584_v13, 2  ;;  %v476_v55 = vrot.slane %v2587_v14, 2  ;;  %v2131_v30 = vld [vmem:[%s2488_s30 + $0x68] sm:$0xff]   ;;  %v2132_v37 = vld [vmem:[%s2488_s30 + $0x98] sm:$0xff]  }
  0x3a   : > { %v2068_v60 = vpack.i.bf16 %v383_v42, %v381_v34  ;;  %v2073_v61 = vpack.i.bf16 %v472_v50, %v470_v43  ;;  %v386_v62 = vsel %vm353_vm0, %v384_v38, %v385_v44  ;;  %v388_v0 = vsel %vm353_vm0, %v385_v44, %v387_v45  ;;  %1875 = vmatpush3.bf16.msra.mxu1 %v2129_v18  ;;  %v2133_v38 = vld [vmem:[%s2488_s30 + $0x28] sm:$0xff]   ;;  %v2134_v45 = vld [vmem:[%s2488_s30 + $0x70] sm:$0xff]  }
  0x3b   : > { %v389_v1 = vrot.slane %v2606_v39, 1  ;;  %v390_v4 = vrot.slane %v2609_v40, 1  ;;  %v392_v5 = vrot.slane %v2612_v41, 1  ;;  %v475_v8 = vsel %vm442_vm1, %v473_v52, %v474_v53  ;;  %1789 = vmatpush3.bf16.msra.mxu0 %v2130_v19  ;;  %1876 = vmatprep.subr.bf16.mxu1 %v2132_v37  ;;  %v2141_v19 = vld [vmem:[%s2488_s30 + $0xb8] sm:$0xff]  }
  0x3c   : > { %2059 = vrot.lane.b32.xlu0 %v2058_v33, %s2352_s25  ;;  %v477_v11 = vsel %vm442_vm1, %v474_v53, %v476_v55  ;;  %v478_v12 = vrot.slane %v2606_v39, 2  ;;  %v479_v14 = vrot.slane %v2609_v40, 2  ;;  %v481_v22 = vrot.slane %v2612_v41, 2  ;;  %1790 = vmatprep.subr.bf16.mxu0 %v2131_v30 }
  0x3d   : > { %2064 = vrot.lane.b32.xlu1 %v2063_v49, %s2353_s26  ;;  %v585_v23 = vrot.slane %v2626_v54, 1  ;;  %v586_v24 = vrot.slane %v2630_v56, 1  ;;  %v588_v25 = vrot.slane %v325_v63, 1  ;;  %v2078_v26 = vpack.i.bf16 %v388_v0, %v386_v62  ;;  %v2138_v0 = vld [vmem:[%s2488_s30 + $0xa8] sm:$0xff]  }
  0x3e   : > { %v2083_v27 = vpack.i.bf16 %v477_v11, %v475_v8  ;;  %v391_v28 = vsel %vm353_vm0, %v389_v1, %v390_v4  ;;  %v596_v29 = vrot.slane %v2626_v54, 2  ;;  %v393_v31 = vsel %vm353_vm0, %v390_v4, %v392_v5  ;;  %1877 = vmatpush3.bf16.msra.mxu1 %v2132_v37  ;;  %v2139_v8 = vld [vmem:[%s2488_s30 + $0x38] sm:$0xff]  }
  0x3f   : > { %v480_v32 = vsel %vm442_vm1, %v478_v12, %v479_v14  ;;  %v597_v33 = vrot.slane %v2630_v56, 2  ;;  %v599_v34 = vrot.slane %v325_v63, 2  ;;  %v482_v41 = vsel %vm442_vm1, %v479_v14, %v481_v22  ;;  %1791 = vmatpush3.bf16.msra.mxu0 %v2133_v38  ;;  %1878 = vmatprep.subr.bf16.mxu1 %v2135_v48  ;;  %v2137_v63 = vld [vmem:[%s2488_s30 + $0x78] sm:$0xff]   ;;  %v2140_v14 = vld [vmem:[%s2488_s30 + $0xb0] sm:$0xff]   ;;  %s1776_s30 = sshll.u32 %s2334_s23, 6 }
  0x40   : > { %2069 = vrot.lane.b32.xlu0 %v2068_v60, %s2352_s25  ;;  %v616_v42 = vrot.slane %v2647_v15, 1  ;;  %v617_v43 = vrot.slane %v2650_v16, 1  ;;  %v619_v44 = vrot.slane %v2653_v17, 1  ;;  %v627_v47 = vrot.slane %v2647_v15, 2  ;;  %1792 = vmatprep.subr.bf16.mxu0 %v2134_v45 }
  0x41   : > { %2074 = vrot.lane.b32.xlu1 %v2073_v61, %s2353_s26  ;;  %v2088_v49 = vpack.i.bf16 %v393_v31, %v391_v28  ;;  %v2093_v50 = vpack.i.bf16 %v482_v41, %v480_v32  ;;  %v587_v52 = vsel %vm353_vm0, %v585_v23, %v586_v24  ;;  %v589_v53 = vsel %vm353_vm0, %v586_v24, %v588_v25 }
  0x42   : > { %v628_v55 = vrot.slane %v2650_v16, 2  ;;  %v598_v60 = vsel %vm442_vm1, %v596_v29, %v597_v33  ;;  %v600_v61 = vsel %vm442_vm1, %v597_v33, %v599_v34  ;;  %v630_v62 = vrot.slane %v2653_v17, 2  ;;  %1879 = vmatpush3.bf16.msra.mxu1 %v2135_v48 }
  0x43   : > { %v2098_v1 = vpack.i.bf16 %v589_v53, %v587_v52  ;;  %v2103_v4 = vpack.i.bf16 %v600_v61, %v598_v60  ;;  %v618_v5 = vsel %vm353_vm0, %v616_v42, %v617_v43  ;;  %v620_v6 = vsel %vm353_vm0, %v617_v43, %v619_v44  ;;  %1793 = vmatpush3.bf16.msra.mxu0 %v2136_v59 }
  0x44   : > { %2079 = vrot.lane.b32.xlu0 %v2078_v26, %s2352_s25  ;;  %v629_v11 = vsel %vm442_vm1, %v627_v47, %v628_v55  ;;  %v631_v12 = vsel %vm442_vm1, %v628_v55, %v630_v62  ;;  %1794 = vmatprep.subr.bf16.mxu0 %v2137_v63  ;;  %v2108_v17 = vpack.i.bf16 %v620_v6, %v618_v5 }
  0x45   : > { %2084 = vrot.lane.b32.xlu1 %v2083_v27, %s2353_s26  ;;  %1880 = vmatprep.subr.bf16.mxu1 %v2138_v0  ;;  %v2113_v18 = vpack.i.bf16 %v631_v12, %v629_v11 }
  0x46   : > { %1881 = vmatpush3.bf16.msra.mxu1 %v2138_v0 }
  0x47   : > { %1795 = vmatpush3.bf16.msra.mxu0 %v2139_v8  ;;  %1882 = vmatprep.subr.bf16.mxu1 %v2140_v14 }
  0x48   : > { %2089 = vrot.lane.b32.xlu0 %v2088_v49, %s2352_s25 }
  0x49   : > { %2094 = vrot.lane.b32.xlu1 %v2093_v50, %s2353_s26 }
  0x4a   : > { %1883 = vmatpush3.bf16.msra.mxu1 %v2140_v14 }
  0x4b   : > { %1884 = vmatprep.subr.bf16.mxu1 %v2141_v19 }
  0x4c   : > { %2099 = vrot.lane.b32.xlu0 %v2098_v1, %s2352_s25 }
  0x4d   : > { %2104 = vrot.lane.b32.xlu1 %v2103_v4, %s2353_s26 }
  0x4e   : > { %1885 = vmatpush3.bf16.msra.mxu1 %v2141_v19 }
  0x50   : > { %2109 = vrot.lane.b32.xlu0 %v2108_v17, %s2352_s25  ;;  %s2938_s25 = scalar_lea.vmem [#allocation2], %s1644_s15 }
  0x51   : > { %2114 = vrot.lane.b32.xlu1 %v2113_v18, %s2353_s26  ;;  %s1774_s26 = sshll.u32 %s2326_s21, 4  ;;  %s1523_s21 = sshll.u32 %s2938_s25, 4  ;;  %s2994_s21 = int_to_ptr.vmem [resolvable:$true] %s1523_s21 }
  0x52   : > { %s1518_s29 = sadd.s32 %s1775_s24, %s1774_s26  ;;  %p2247_p4 = scmp.lt.s32.totalorder %s2994_s21, %s2245_s12 }
  0x53   : > { %s1520_s7 = sadd.s32 %s1776_s30, %s1518_s29 }
  0x54   : > { %s1777_s17 = sshll.u32 %s1520_s7, 7 }
  0x55   : > { %s2992_s6 = scalar_lea.hbm %s3066_s5, %s1777_s17 }
  0x9e   : > { %v2020_v22 = vpop.permute.xlu0 %2019 }
  0x9f   : > { %v2022_v23 = vunpack.i.h.bf16 %v2020_v22  ;;  %v2021_v24 = vunpack.i.l.bf16 %v2020_v22  ;;  %v2030_v25 = vpop.permute.xlu1 %2029 }
  0xa0   : > { %v2032_v26 = vunpack.i.h.bf16 %v2030_v25  ;;  %v2031_v27 = vunpack.i.l.bf16 %v2030_v25 }
  0xa1   : > { %v534_v28 = vsel %vm531_vm2, %v2498_v2, %v2021_v24  ;;  %v535_v29 = vsel %vm531_vm2, %v2501_v3, %v2022_v23 }
  0xa2   : > { %v2025_v30 = vpop.permute.xlu0 %2024  ;;  %v551_v31 = vsel %vm548_vm3, %v534_v28, %v2031_v27  ;;  %v552_v32 = vsel %vm548_vm3, %v535_v29, %v2032_v26 }
  0xa3   : > { %v2027_v34 = vunpack.i.h.bf16 %v2025_v30  ;;  %v2026_v37 = vunpack.i.l.bf16 %v2025_v30  ;;  %v2035_v38 = vpop.permute.xlu1 %2034  ;;  %v1675_v41 = vpack.c.bf16 %v552_v32, %v551_v31 }
  0xa4   : > { %v2037_v42 = vunpack.i.h.bf16 %v2035_v38  ;;  %v2036_v43 = vunpack.i.l.bf16 %v2035_v38 }
  0xa5   : > { %v533_v2 = vsel %vm531_vm2, %v2511_v10, %v2027_v34  ;;  %v532_v3 = vsel %vm531_vm2, %v2508_v9, %v2026_v37  ;;  %1676 = vmatprep.mubr.msk.bf16.mxu0 %vm2707_vm5, %v1675_v41 }
  0xa6   : > { %v549_v44 = vsel %vm548_vm3, %v532_v3, %v2036_v43  ;;  %v550_v45 = vsel %vm548_vm3, %v533_v2, %v2037_v42  ;;  %v2040_v47 = vpop.permute.xlu0 %2039 }
  0xa7   : > { %v1678_v48 = vpack.c.bf16 %v550_v45, %v549_v44  ;;  %v2042_v49 = vunpack.i.h.bf16 %v2040_v47  ;;  %v2041_v50 = vunpack.i.l.bf16 %v2040_v47  ;;  %v2045_v52 = vpop.permute.xlu1 %2044 }
  0xa8   : > { %v2047_v53 = vunpack.i.h.bf16 %v2045_v52  ;;  %v2046_v55 = vunpack.i.l.bf16 %v2045_v52 }
  0xa9   : > { %v537_v10 = vsel %vm531_vm2, %v2524_v21, %v2042_v49  ;;  %v536_v9 = vsel %vm531_vm2, %v2521_v20, %v2041_v50  ;;  %1679 = vmatmul.mubr.msk.bf16.vlgmr.msra.gmra.mrb[0].mxu0 %vm2707_vm5, %v1678_v48 }
  0xaa   : > { %v553_v59 = vsel %vm548_vm3, %v536_v9, %v2046_v55  ;;  %v554_v60 = vsel %vm548_vm3, %v537_v10, %v2047_v53  ;;  %v2050_v61 = vpop.permute.xlu0 %2049 }
  0xab   : > { %v1681_v62 = vpack.c.bf16 %v554_v60, %v553_v59  ;;  %v2052_v63 = vunpack.i.h.bf16 %v2050_v61  ;;  %v2051_v0 = vunpack.i.l.bf16 %v2050_v61  ;;  %v2055_v1 = vpop.permute.xlu1 %2054 }
  0xac   : > { %v2057_v4 = vunpack.i.h.bf16 %v2055_v1  ;;  %v2056_v5 = vunpack.i.l.bf16 %v2055_v1 }
  0xad   : > { %v539_v21 = vsel %vm531_vm2, %v2539_v36, %v2052_v63  ;;  %v538_v20 = vsel %vm531_vm2, %v2536_v35, %v2051_v0  ;;  %1682 = vmatprep.mubr.msk.bf16.mxu0 %vm2707_vm5, %v1681_v62  ;;  %1886 = vmatprep.mubr.msk.bf16.mxu1 %vm2707_vm5, %v1681_v62 }
  0xae   : > { %v555_v6 = vsel %vm548_vm3, %v538_v20, %v2056_v5  ;;  %v556_v8 = vsel %vm548_vm3, %v539_v21, %v2057_v4  ;;  %v2060_v11 = vpop.permute.xlu0 %2059 }
  0xaf   : > { %v1687_v12 = vpack.c.bf16 %v556_v8, %v555_v6  ;;  %v2062_v14 = vunpack.i.h.bf16 %v2060_v11  ;;  %v2061_v17 = vunpack.i.l.bf16 %v2060_v11  ;;  %v2065_v18 = vpop.permute.xlu1 %2064 }
  0xb0   : > { %v2067_v19 = vunpack.i.h.bf16 %v2065_v18  ;;  %v2066_v36 = vunpack.i.l.bf16 %v2065_v18 }
  0xb1   : > { %1685 = vmatmul.mubr.msk.bf16.gmra.mrb[4].mxu0 %vm2707_vm5, %v1675_v41  ;;  %1887 = vmatmul.mubr.msk.bf16.vlgmr.msra.gmra.mrb[0].mxu1 %vm2707_vm5, %v1687_v12  ;;  %v541_v35 = vsel %vm531_vm2, %v2556_v51, %v2062_v14  ;;  %v540_v22 = vsel %vm531_vm2, %v2550_v46, %v2061_v17 }
  0xb2   : > { %v557_v23 = vsel %vm548_vm3, %v540_v22, %v2066_v36  ;;  %v558_v24 = vsel %vm548_vm3, %v541_v35, %v2067_v19  ;;  %v2070_v25 = vpop.permute.xlu0 %2069  ;;  %1688 = vmatprep.mubr.msk.bf16.mxu0 %vm2707_vm5, %v1687_v12 }
  0xb3   : > { %v2749_v26 = vpack.c.bf16 %v558_v24, %v557_v23  ;;  %v2072_v27 = vunpack.i.h.bf16 %v2070_v25  ;;  %v2071_v28 = vunpack.i.l.bf16 %v2070_v25  ;;  %v2075_v29 = vpop.permute.xlu1 %2074  ;;  %v2828_v25 = vld [vmem:[%s293_s10] ss:$0 sm:$0xff]  ;;  %s3003_s10 = scalar_lea.sflag [#allocation3], %s274_s14 }
  0xb4   : > { %v2077_v30 = vunpack.i.h.bf16 %v2075_v29  ;;  %v2076_v31 = vunpack.i.l.bf16 %v2075_v29 }
  0xb5   : > { %v543_v51 = vsel %vm531_vm2, %v2567_v58, %v2072_v27  ;;  %v542_v46 = vsel %vm531_vm2, %v2564_v57, %v2071_v28  ;;  %1890 = vmatprep.mubr.msk.bf16.mxu1 %vm2707_vm5, %v2749_v26 }
  0xb6   : > { %v559_v32 = vsel %vm548_vm3, %v542_v46, %v2076_v31  ;;  %v560_v34 = vsel %vm548_vm3, %v543_v51, %v2077_v30  ;;  %v2080_v37 = vpop.permute.xlu0 %2079 }
  0xb7   : > { %v1699_v38 = vpack.c.bf16 %v560_v34, %v559_v32  ;;  %v2082_v41 = vunpack.i.h.bf16 %v2080_v37  ;;  %v2081_v42 = vunpack.i.l.bf16 %v2080_v37  ;;  %v2085_v43 = vpop.permute.xlu1 %2084 }
  0xb8   : > { %v2087_v2 = vunpack.i.h.bf16 %v2085_v43  ;;  %v2086_v3 = vunpack.i.l.bf16 %v2085_v43 }
  0xb9   : > { %1691 = vmatmul.mubr.msk.bf16.gmra.mrb[8].mxu0 %vm2707_vm5, %v1681_v62  ;;  %1891 = vmatmul.mubr.msk.bf16.gmra.mrb[4].mxu1 %vm2707_vm5, %v1699_v38  ;;  %v545_v57 = vsel %vm531_vm2, %v2584_v13, %v2082_v41  ;;  %v544_v58 = vsel %vm531_vm2, %v2578_v7, %v2081_v42 }
  0xba   : > { %1694 = vmatprep.mubr.msk.bf16.mxu0 %vm2707_vm5, %v2749_v26  ;;  %v561_v44 = vsel %vm548_vm3, %v544_v58, %v2086_v3  ;;  %v562_v45 = vsel %vm548_vm3, %v545_v57, %v2087_v2  ;;  %v2090_v47 = vpop.permute.xlu0 %2089 }
  0xbb   : > { %v1705_v48 = vpack.c.bf16 %v562_v45, %v561_v44  ;;  %v2092_v49 = vunpack.i.h.bf16 %v2090_v47  ;;  %v2091_v50 = vunpack.i.l.bf16 %v2090_v47  ;;  %v2095_v52 = vpop.permute.xlu1 %2094 }
  0xbc   : > { %v2097_v53 = vunpack.i.h.bf16 %v2095_v52  ;;  %v2096_v55 = vunpack.i.l.bf16 %v2095_v52 }
  0xbd   : > { %v547_v13 = vsel %vm531_vm2, %v2609_v40, %v2092_v49  ;;  %v546_v7 = vsel %vm531_vm2, %v2606_v39, %v2091_v50  ;;  %1894 = vmatprep.mubr.msk.bf16.mxu1 %vm2707_vm5, %v1705_v48 }
  0xbe   : > { %v563_v10 = vsel %vm548_vm3, %v546_v7, %v2096_v55  ;;  %v564_v9 = vsel %vm548_vm3, %v547_v13, %v2097_v53  ;;  %v2100_v59 = vpop.permute.xlu0 %2099 }
  0xbf   : > { %v1711_v60 = vpack.c.bf16 %v564_v9, %v563_v10  ;;  %v2102_v61 = vunpack.i.h.bf16 %v2100_v59  ;;  %v2101_v62 = vunpack.i.l.bf16 %v2100_v59  ;;  %v2105_v63 = vpop.permute.xlu1 %2104 }
  0xc0   : > { %v2107_v0 = vunpack.i.h.bf16 %v2105_v63  ;;  %v2106_v1 = vunpack.i.l.bf16 %v2105_v63 }
  0xc1   : > { %1697 = vmatmul.mubr.msk.bf16.gmra.mrb[12].mxu0 %vm2707_vm5, %v1687_v12  ;;  %1895 = vmatmul.mubr.msk.bf16.gmra.mrb[8].mxu1 %vm2707_vm5, %v1711_v60  ;;  %v608_v39 = vsel %vm531_vm2, %v2630_v56, %v2102_v61  ;;  %v607_v40 = vsel %vm531_vm2, %v2626_v54, %v2101_v62 }
  0xc2   : > { %1700 = vmatprep.mubr.msk.bf16.mxu0 %vm2707_vm5, %v1699_v38  ;;  %v609_v4 = vsel %vm548_vm3, %v607_v40, %v2106_v1  ;;  %v610_v5 = vsel %vm548_vm3, %v608_v39, %v2107_v0  ;;  %v2110_v21 = vpop.permute.xlu0 %2109 }
  0xc3   : > { %v1717_v20 = vpack.c.bf16 %v610_v5, %v609_v4  ;;  %v2112_v6 = vunpack.i.h.bf16 %v2110_v21  ;;  %v2111_v8 = vunpack.i.l.bf16 %v2110_v21  ;;  %v2115_v11 = vpop.permute.xlu1 %2114 }
  0xc4   : > { %v2117_v12 = vunpack.i.h.bf16 %v2115_v11  ;;  %v2116_v14 = vunpack.i.l.bf16 %v2115_v11 }
  0xc5   : > { %v639_v56 = vsel %vm531_vm2, %v2650_v16, %v2112_v6  ;;  %v638_v54 = vsel %vm531_vm2, %v2647_v15, %v2111_v8  ;;  %1898 = vmatprep.mubr.msk.bf16.mxu1 %vm2707_vm5, %v1717_v20  ;;  %v2142_v15 = vld [vmem:[%s3064_s3] sm:$0xff]   ;;  %v2143_v16 = vld [vmem:[%s3064_s3 + $0x8] sm:$0xff]  }
  0xc6   : > { %v640_v17 = vsel %vm548_vm3, %v638_v54, %v2116_v14  ;;  %v641_v18 = vsel %vm548_vm3, %v639_v56, %v2117_v12  ;;  %1902 = vmatprep.subr.bf16.mxu1 %v2142_v15 }
  0xc7   : > { %v1744_v19 = vpack.c.bf16 %v641_v18, %v640_v17  ;;  %1903 = vmatpush3.bf16.msra.mxu1 %v2142_v15 }
  0xc8   : > { %1904 = vmatprep.subr.bf16.mxu1 %v2143_v16 }
  0xc9   : > { %1703 = vmatmul.mubr.msk.bf16.gmra.mrb[16].mxu0 %vm2707_vm5, %v2749_v26  ;;  %1899 = vmatmul.mubr.msk.bf16.gmra.mrb[12].mxu1 %vm2707_vm5, %v1744_v19 }
  0xca   : > { %1706 = vmatprep.mubr.msk.bf16.mxu0 %vm2707_vm5, %v1705_v48 }
  0xcb   : > { %1905 = vmatpush3.bf16.msra.mxu1 %v2143_v16 }
  0xd1   : > { %1709 = vmatmul.mubr.msk.bf16.gmra.mrb[20].mxu0 %vm2707_vm5, %v1699_v38 }
  0xd2   : > { %1712 = vmatprep.mubr.msk.bf16.mxu0 %vm2707_vm5, %v1711_v60 }
  0xd9   : > { %1715 = vmatmul.mubr.msk.bf16.gmra.mrb[24].mxu0 %vm2707_vm5, %v1705_v48 }
  0xda   : > { %1718 = vmatprep.mubr.msk.bf16.mxu0 %vm2707_vm5, %v1717_v20 }
  0xe1   : > { %1721 = vmatmul.mubr.msk.bf16.gmra.mrb[28].mxu0 %vm2707_vm5, %v1711_v60 }
 0x17c   : > { %v1796_v36 = vpop.f32.mrb[0].mxu0 }
 0x17d   : > { %v1797_v35 = vpop.f32.mrb[1].mxu0 }
 0x17e   : > { %v1798_v22 = vadd.f32 %v1797_v35, %v1796_v36  ;;  %v1799_v23 = vpop.f32.mrb[2].mxu0 }
 0x17f   : > { %v1800_v33 = vpop.f32.mrb[3].mxu0 }
 0x180   : > { %v1801_v24 = vadd.f32 %v1800_v33, %v1799_v23  ;;  %v888_v28 = vadd.f32 %v1798_v22, %v2828_v25 }
 0x182   : > { %v891_v37 = vadd.f32 %v1801_v24, %v2828_v25 }
 0x184   : > { %v1802_v26 = vpop.f32.mrb[4].mxu0  ;;  %v1888_v27 = vpop.f32.mrb[0].mxu1 }
 0x185   : > { %v1803_v29 = vpop.f32.mrb[5].mxu0  ;;  %v984_v30 = vpop.f32.mrb[1].mxu1 }
 0x186   : > { %v1804_v31 = vadd.f32 %v1803_v29, %v1802_v26  ;;  %v985_v51 = vadd.f32 %v984_v30, %v888_v28  ;;  %v1805_v46 = vpop.f32.mrb[6].mxu0  ;;  %v1889_v32 = vpop.f32.mrb[2].mxu1 }
 0x187   : > { %v1806_v34 = vpop.f32.mrb[7].mxu0  ;;  %v987_v38 = vpop.f32.mrb[3].mxu1 }
 0x188   : > { %v896_v41 = vadd.f32 %v1804_v31, %v2828_v25  ;;  %v1746_v42 = vmul.f32 -1.442695, %v985_v51  ;;  %v1807_v43 = vadd.f32 %v1806_v34, %v1805_v46  ;;  %v988_v2 = vadd.f32 %v987_v38, %v891_v37 }
 0x189   : > { %v1047_v58 = vmax.f32 %v985_v51, 0.0 }
 0x18a   : > { %v993_v3 = vadd.f32 %v1888_v27, %v896_v41  ;;  %2144 = vpow2.f32 %v1746_v42  ;;  %v899_v57 = vadd.f32 %v1807_v43, %v2828_v25  ;;  %v1048_v44 = vmax.f32 %v988_v2, 0.0 }
 0x18b   : > { %v1747_v45 = vmul.f32 -1.442695, %v988_v2 }
 0x18c   : > { %v1748_v47 = vmul.f32 -1.442695, %v993_v3  ;;  %v996_v48 = vadd.f32 %v1889_v32, %v899_v57  ;;  %v1808_v49 = vpop.f32.mrb[8].mxu0  ;;  %v1892_v50 = vpop.f32.mrb[4].mxu1  ;;  %v1049_v52 = vmax.f32 %v993_v3, 0.0  ;;  %v1159_v53 = vpack.c.bf16 %v1048_v44, %v1047_v58 }
 0x18d   : > { %2146 = vpow2.f32 %v1747_v45  ;;  %v1809_v55 = vpop.f32.mrb[9].mxu0  ;;  %v1000_v13 = vpop.f32.mrb[5].mxu1 }
 0x18e   : > { %2148 = vpow2.f32 %v1748_v47  ;;  %v1050_v7 = vmax.f32 %v996_v48, 0.0  ;;  %v1749_v10 = vmul.f32 -1.442695, %v996_v48  ;;  %v1810_v9 = vadd.f32 %v1809_v55, %v1808_v49  ;;  %v1811_v59 = vpop.f32.mrb[10].mxu0  ;;  %v1893_v60 = vpop.f32.mrb[6].mxu1  ;;  %1906 = vmatprep.mubr.msk.bf16.mxu1 %vm531_vm2, %v1159_v53 }
 0x18f   : > { %v1812_v61 = vpop.f32.mrb[11].mxu0  ;;  %v1003_v62 = vpop.f32.mrb[7].mxu1 }
 0x190   : > { %2150 = vpow2.f32 %v1749_v10  ;;  %v1160_v63 = vpack.c.bf16 %v1050_v7, %v1049_v52  ;;  %v1813_v0 = vadd.f32 %v1812_v61, %v1811_v59  ;;  %v904_v1 = vadd.f32 %v1810_v9, %v2828_v25 }
 0x192   : > { %v1001_v39 = vadd.f32 %v1000_v13, %v904_v1  ;;  %1907 = vmatmul.mubr.msk.bf16.vlgmr.msra.gmra.mrb[16].mxu1 %vm531_vm2, %v1160_v63  ;;  %v907_v40 = vadd.f32 %v1813_v0, %v2828_v25 }
 0x194   : > { %v2145_v4 = vpop.eup %2144  ;;  %v1750_v5 = vmul.f32 -1.442695, %v1001_v39  ;;  %v1004_v21 = vadd.f32 %v1003_v62, %v907_v40  ;;  %v1814_v20 = vpop.f32.mrb[12].mxu0  ;;  %v1051_v11 = vmax.f32 %v1001_v39, 0.0 }
 0x195   : > { %v2838_v6 = vpop.f32.mrb[8].mxu1  ;;  %v1111_v8 = vadd.f32 1.0, %v2145_v4  ;;  %v1815_v12 = vpop.f32.mrb[13].mxu0 }
 0x196   : > { %v1016_v14 = vpop.f32.mrb[9].mxu1  ;;  %2152 = vpow2.f32 %v1750_v5  ;;  %v1052_v56 = vmax.f32 %v1004_v21, 0.0  ;;  %v1751_v54 = vmul.f32 -1.442695, %v1004_v21  ;;  %v1816_v17 = vadd.f32 %v1815_v12, %v1814_v20  ;;  %v1817_v18 = vpop.f32.mrb[14].mxu0 }
 0x197   : > { %v2840_v19 = vpop.f32.mrb[10].mxu1  ;;  %v2147_v15 = vpop.eup %2146  ;;  %2154 = vrcp.f32 %v1111_v8 }
 0x198   : > { %v1818_v16 = vpop.f32.mrb[15].mxu0  ;;  %v1019_v36 = vpop.f32.mrb[11].mxu1  ;;  %v1112_v22 = vadd.f32 1.0, %v2147_v15  ;;  %2156 = vpow2.f32 %v1751_v54  ;;  %v1161_v23 = vpack.c.bf16 %v1052_v56, %v1051_v11  ;;  %v912_v33 = vadd.f32 %v1816_v17, %v2828_v25 }
 0x199   : > { %v2149_v35 = vpop.eup %2148  ;;  %v1819_v26 = vadd.f32 %v1818_v16, %v1817_v18 }
 0x19a   : > { %v1113_v24 = vadd.f32 1.0, %v2149_v35  ;;  %v2151_v27 = vpop.eup %2150  ;;  %2158 = vrcp.f32 %v1112_v22  ;;  %v1009_v28 = vadd.f32 %v1892_v50, %v912_v33  ;;  %1910 = vmatprep.mubr.msk.bf16.mxu1 %vm531_vm2, %v1161_v23 }
 0x19b   : > { %v1114_v29 = vadd.f32 1.0, %v2151_v27  ;;  %v915_v30 = vadd.f32 %v1819_v26, %v2828_v25 }
 0x19c   : > { %2160 = vrcp.f32 %v1113_v24  ;;  %v1752_v31 = vmul.f32 -1.442695, %v1009_v28  ;;  %v1820_v51 = vpop.f32.mrb[16].mxu0  ;;  %v2845_v46 = vpop.f32.mrb[12].mxu1  ;;  %v1053_v43 = vmax.f32 %v1009_v28, 0.0 }
 0x19d   : > { %2162 = vrcp.f32 %v1114_v29  ;;  %v1012_v32 = vadd.f32 %v1893_v60, %v915_v30  ;;  %v1821_v34 = vpop.f32.mrb[17].mxu0  ;;  %v2847_v37 = vpop.f32.mrb[13].mxu1 }
 0x19e   : > { %2164 = vpow2.f32 %v1752_v31  ;;  %v1822_v38 = vadd.f32 %v1821_v34, %v1820_v51  ;;  %v1823_v41 = vpop.f32.mrb[18].mxu0  ;;  %v2849_v42 = vpop.f32.mrb[14].mxu1 }
 0x19f   : > { %v1054_v2 = vmax.f32 %v1012_v32, 0.0  ;;  %v1753_v3 = vmul.f32 -1.442695, %v1012_v32  ;;  %v1824_v57 = vpop.f32.mrb[19].mxu0  ;;  %v2851_v58 = vpop.f32.mrb[15].mxu1 }
 0x1a0   : > { %v2153_v44 = vpop.eup %2152  ;;  %v1825_v45 = vadd.f32 %v1824_v57, %v1823_v41  ;;  %v920_v47 = vadd.f32 %v1822_v38, %v2828_v25 }
 0x1a1   : > { %v2155_v48 = vpop.eup %2154  ;;  %v1115_v49 = vadd.f32 1.0, %v2153_v44  ;;  %2166 = vpow2.f32 %v1753_v3  ;;  %v1162_v50 = vpack.c.bf16 %v1054_v2, %v1053_v43 }
 0x1a2   : > { %v2157_v52 = vpop.eup %2156  ;;  %v1017_v53 = vadd.f32 %v1016_v14, %v920_v47  ;;  %1343 = vrot.lane.b32.xlu0 %v2155_v48, %s2354_s28  ;;  %v923_v55 = vadd.f32 %v1825_v45, %v2828_v25 }
 0x1a3   : > { %2168 = vrcp.f32 %v1115_v49  ;;  %v1116_v13 = vadd.f32 1.0, %v2157_v52  ;;  %1911 = vmatmul.mubr.msk.bf16.gmra.mrb[20].mxu1 %vm531_vm2, %v1162_v50 }
 0x1a4   : > { %v2159_v7 = vpop.eup %2158  ;;  %v1754_v10 = vmul.f32 -1.442695, %v1017_v53  ;;  %v1020_v9 = vadd.f32 %v1019_v36, %v923_v55  ;;  %v1826_v59 = vpop.f32.mrb[20].mxu0  ;;  %v1055_v61 = vmax.f32 %v1017_v53, 0.0 }
 0x1a5   : > { %2170 = vrcp.f32 %v1116_v13  ;;  %1345 = vrot.lane.b32.xlu1 %v2159_v7, %s2354_s28  ;;  %v1827_v62 = vpop.f32.mrb[21].mxu0 }
 0x1a6   : > { %v2161_v60 = vpop.eup %2160  ;;  %2172 = vpow2.f32 %v1754_v10  ;;  %v1056_v63 = vmax.f32 %v1020_v9, 0.0  ;;  %v1755_v0 = vmul.f32 -1.442695, %v1020_v9  ;;  %v1828_v1 = vadd.f32 %v1827_v62, %v1826_v59  ;;  %v1829_v39 = vpop.f32.mrb[22].mxu0 }
 0x1a7   : > { %1347 = vrot.lane.b32.xlu0 %v2161_v60, %s2354_s28  ;;  %v2163_v40 = vpop.eup %2162  ;;  %v1830_v4 = vpop.f32.mrb[23].mxu0 }
 0x1a8   : > { %v2165_v5 = vpop.eup %2164  ;;  %2174 = vpow2.f32 %v1755_v0  ;;  %v1163_v21 = vpack.c.bf16 %v1056_v63, %v1055_v61  ;;  %v928_v20 = vadd.f32 %v1828_v1, %v2828_v25  ;;  %v1831_v8 = vadd.f32 %v1830_v4, %v1829_v39 }
 0x1a9   : > { %v1117_v11 = vadd.f32 1.0, %v2165_v5  ;;  %1349 = vrot.lane.b32.xlu1 %v2163_v40, %s2354_s28 }
 0x1aa   : > { %v1025_v12 = vadd.f32 %v2838_v6, %v928_v20  ;;  %v931_v14 = vadd.f32 %v1831_v8, %v2828_v25  ;;  %1914 = vmatprep.mubr.msk.bf16.mxu1 %vm531_vm2, %v1163_v21 }
 0x1ab   : > { %v2167_v56 = vpop.eup %2166  ;;  %2176 = vrcp.f32 %v1117_v11 }
 0x1ac   : > { %v1118_v54 = vadd.f32 1.0, %v2167_v56  ;;  %v1756_v17 = vmul.f32 -1.442695, %v1025_v12  ;;  %v1028_v18 = vadd.f32 %v2840_v19, %v931_v14  ;;  %v1832_v15 = vpop.f32.mrb[24].mxu0  ;;  %v1057_v36 = vmax.f32 %v1025_v12, 0.0 }
 0x1ad   : > { %v2169_v16 = vpop.eup %2168  ;;  %v1833_v35 = vpop.f32.mrb[25].mxu0 }
 0x1ae   : > { %2178 = vrcp.f32 %v1118_v54  ;;  %v1058_v22 = vmax.f32 %v1028_v18, 0.0  ;;  %v1757_v23 = vmul.f32 -1.442695, %v1028_v18  ;;  %v1834_v33 = vadd.f32 %v1833_v35, %v1832_v15  ;;  %v1835_v24 = vpop.f32.mrb[26].mxu0  ;;  %1351 = vrot.lane.b32.xlu0 %v2169_v16, %s2354_s28 }
 0x1af   : > { %v2171_v6 = vpop.eup %2170  ;;  %2180 = vpow2.f32 %v1756_v17  ;;  %v1836_v26 = vpop.f32.mrb[27].mxu0  ;;  %v2891_v17 = vld [vmem:[%s3065_s4] ss:$0 sm:$0xff] }
 0x1b0   : > { %v2173_v27 = vpop.eup %2172  ;;  %2182 = vpow2.f32 %v1757_v23  ;;  %v1837_v28 = vadd.f32 %v1836_v26, %v1835_v24  ;;  %1353 = vrot.lane.b32.xlu1 %v2171_v6, %s2354_s28  ;;  %v936_v19 = vadd.f32 %v1834_v33, %v2828_v25  ;;  %v1164_v29 = vpack.c.bf16 %v1058_v22, %v1057_v36 }
 0x1b1   : > { %v1119_v30 = vadd.f32 1.0, %v2173_v27 }
 0x1b2   : > { %v2175_v31 = vpop.eup %2174  ;;  %v1033_v51 = vadd.f32 %v2847_v37, %v936_v19  ;;  %1915 = vmatmul.mubr.msk.bf16.gmra.mrb[24].mxu1 %vm531_vm2, %v1164_v29  ;;  %v939_v32 = vadd.f32 %v1837_v28, %v2828_v25 }
 0x1b3   : > { %2184 = vrcp.f32 %v1119_v30  ;;  %v1120_v34 = vadd.f32 1.0, %v2175_v31 }
 0x1b4   : > { %v1758_v38 = vmul.f32 -1.442695, %v1033_v51  ;;  %v1036_v41 = vadd.f32 %v2851_v58, %v939_v32  ;;  %v1838_v43 = vpop.f32.mrb[28].mxu0  ;;  %v1059_v3 = vmax.f32 %v1033_v51, 0.0 }
 0x1b5   : > { %v2177_v2 = vpop.eup %2176  ;;  %2186 = vrcp.f32 %v1120_v34  ;;  %v1839_v57 = vpop.f32.mrb[29].mxu0 }
 0x1b6   : > { %2188 = vpow2.f32 %v1758_v38  ;;  %v1060_v44 = vmax.f32 %v1036_v41, 0.0  ;;  %v1759_v45 = vmul.f32 -1.442695, %v1036_v41  ;;  %v1840_v47 = vadd.f32 %v1839_v57, %v1838_v43  ;;  %v1841_v48 = vpop.f32.mrb[30].mxu0  ;;  %1355 = vrot.lane.b32.xlu0 %v2177_v2, %s2354_s28 }
 0x1b7   : > { %v1842_v37 = vpop.f32.mrb[31].mxu0 }
 0x1b8   : > { %v2179_v49 = vpop.eup %2178  ;;  %2190 = vpow2.f32 %v1759_v45  ;;  %v1165_v50 = vpack.c.bf16 %v1060_v44, %v1059_v3  ;;  %v944_v52 = vadd.f32 %v1840_v47, %v2828_v25  ;;  %v1843_v53 = vadd.f32 %v1842_v37, %v1841_v48 }
 0x1b9   : > { %v2181_v58 = vpop.eup %2180  ;;  %1357 = vrot.lane.b32.xlu1 %v2179_v49, %s2354_s28 }
 0x1ba   : > { %v2183_v55 = vpop.eup %2182  ;;  %v1121_v13 = vadd.f32 1.0, %v2181_v58  ;;  %v1041_v7 = vadd.f32 %v2845_v46, %v944_v52  ;;  %v947_v10 = vadd.f32 %v1843_v53, %v2828_v25  ;;  %1918 = vmatprep.mubr.msk.bf16.mxu1 %vm531_vm2, %v1165_v50 }
 0x1bb   : > { %v1122_v9 = vadd.f32 1.0, %v2183_v55 }
 0x1bc   : > { %2192 = vrcp.f32 %v1121_v13  ;;  %v1760_v59 = vmul.f32 -1.442695, %v1041_v7  ;;  %v1044_v60 = vadd.f32 %v2849_v42, %v947_v10  ;;  %v1061_v62 = vmax.f32 %v1041_v7, 0.0 }
 0x1bd   : > { %v2185_v61 = vpop.eup %2184  ;;  %2194 = vrcp.f32 %v1122_v9 }
 0x1be   : > { %2196 = vpow2.f32 %v1760_v59  ;;  %v1062_v63 = vmax.f32 %v1044_v60, 0.0  ;;  %v1761_v0 = vmul.f32 -1.442695, %v1044_v60  ;;  %1359 = vrot.lane.b32.xlu0 %v2185_v61, %s2354_s28 }
 0x1bf   : > { %v2187_v1 = vpop.eup %2186 }
 0x1c0   : > { %v2189_v39 = vpop.eup %2188  ;;  %2198 = vpow2.f32 %v1761_v0  ;;  %1361 = vrot.lane.b32.xlu1 %v2187_v1, %s2354_s28  ;;  %v1166_v25 = vpack.c.bf16 %v1062_v63, %v1061_v62 }
 0x1c1   : > { %v1123_v46 = vadd.f32 1.0, %v2189_v39 }
 0x1c2   : > { %v2191_v40 = vpop.eup %2190  ;;  %1919 = vmatmul.mubr.msk.bf16.gmra.mrb[28].mxu1 %vm531_vm2, %v1166_v25 }
 0x1c3   : > { %2200 = vrcp.f32 %v1123_v46  ;;  %v1124_v42 = vadd.f32 1.0, %v2191_v40 }
 0x1c5   : > { %2202 = vrcp.f32 %v1124_v42 }
 0x1c6   : > { %v2193_v4 = vpop.eup %2192 }
 0x1c7   : > { %v2195_v5 = vpop.eup %2194  ;;  %1363 = vrot.lane.b32.xlu0 %v2193_v4, %s2354_s28 }
 0x1c8   : > { %v2197_v21 = vpop.eup %2196  ;;  %1365 = vrot.lane.b32.xlu1 %v2195_v5, %s2354_s28 }
 0x1c9   : > { %v1125_v20 = vadd.f32 1.0, %v2197_v21 }
 0x1ca   : > { %v2199_v8 = vpop.eup %2198 }
 0x1cb   : > { %2204 = vrcp.f32 %v1125_v20  ;;  %v1126_v11 = vadd.f32 1.0, %v2199_v8 }
 0x1cd   : > { %v2201_v12 = vpop.eup %2200  ;;  %2206 = vrcp.f32 %v1126_v11 }
 0x1ce   : > { %1367 = vrot.lane.b32.xlu0 %v2201_v12, %s2354_s28 }
 0x1cf   : > { %v2203_v14 = vpop.eup %2202 }
 0x1d0   : > { %1369 = vrot.lane.b32.xlu1 %v2203_v14, %s2354_s28 }
 0x1d5   : > { %v2205_v56 = vpop.eup %2204 }
 0x1d6   : > { %1371 = vrot.lane.b32.xlu0 %v2205_v56, %s2354_s28 }
 0x1d7   : > { %v2207_v54 = vpop.eup %2206 }
 0x1d8   : > { %1373 = vrot.lane.b32.xlu1 %v2207_v54, %s2354_s28  ;;  %s2240_s28 = scalar_lea.vmem %s2994_s21, 2048 }
 0x1d9   : > { %p2241_p1 = scmp.ne.s32.totalorder %s2994_s21, %s2240_s28 }
 0x1db   : > { %p2242_p2 = pnand %p2241_p1, %p2451_p5 }
 0x1dd   : > { %p2243_p3 = pneg %p2242_p2 }
 0x214   : > { %v1344_v39 = vpop.permute.xlu0 %1343 }
 0x217   : > { %v1346_v25 = vpop.permute.xlu1 %1345 }
 0x219   : > { %v1348_v46 = vpop.permute.xlu0 %1347 }
 0x21b   : > { %v1350_v40 = vpop.permute.xlu1 %1349 }
 0x220   : > { %v1352_v42 = vpop.permute.xlu0 %1351 }
 0x222   : > { %v1354_v4 = vpop.permute.xlu1 %1353 }
 0x228   : > { %v1356_v5 = vpop.permute.xlu0 %1355 }
 0x22b   : > { %v1358_v21 = vpop.permute.xlu1 %1357 }
 0x230   : > { %v1360_v20 = vpop.permute.xlu0 %1359 }
 0x232   : > { %v1362_v8 = vpop.permute.xlu1 %1361 }
 0x239   : > { %v1364_v11 = vpop.permute.xlu0 %1363 }
 0x23a   : > { %v1366_v12 = vpop.permute.xlu1 %1365 }
 0x240   : > { %v2925_v14 = vpop.permute.xlu0 %1367 }
 0x242   : > { %v2927_v56 = vpop.permute.xlu1 %1369 }
 0x248   : > { %v2930_v54 = vpop.permute.xlu0 %1371 }
 0x265   : > { %v1908_v18 = vpop.f32.mrb[16].mxu1 }
 0x266   : > { %v1257_v15 = vadd.f32 %v1908_v18, %v2891_v17  ;;  %v1248_v16 = vpop.f32.mrb[17].mxu1 }
 0x267   : > { %v1909_v36 = vpop.f32.mrb[18].mxu1  ;;  %v1249_v35 = vadd.f32 %v2891_v17, %v1248_v16 }
 0x268   : > { %2208 = vtanh.f32 %v1257_v15  ;;  %v1260_v22 = vadd.f32 %v1909_v36, %v2891_v17  ;;  %v1251_v23 = vpop.f32.mrb[19].mxu1 }
 0x269   : > { %v1252_v33 = vadd.f32 %v2891_v17, %v1251_v23 }
 0x26a   : > { %2210 = vtanh.f32 %v1260_v22 }
 0x26b   : > { %2212 = vtanh.f32 %v1249_v35 }
 0x26c   : > { %2214 = vtanh.f32 %v1252_v33 }
 0x272   : > { %v2209_v24 = vpop.eup %2208 }
 0x273   : > { %1411 = vrot.lane.b32.xlu0 %v2209_v24, %s2355_s13 }
 0x274   : > { %v2211_v6 = vpop.eup %2210 }
 0x275   : > { %1413 = vrot.lane.b32.xlu1 %v2211_v6, %s2355_s13  ;;  %v2213_v26 = vpop.eup %2212 }
 0x276   : > { %v1912_v27 = vpop.f32.mrb[20].mxu1  ;;  %v2215_v29 = vpop.eup %2214 }
 0x277   : > { %v1273_v28 = vadd.f32 %v1912_v27, %v2891_v17  ;;  %v1264_v19 = vpop.f32.mrb[21].mxu1  ;;  %1407 = vrot.lane.b32.xlu0 %v2213_v26, %s2355_s13 }
 0x278   : > { %v1913_v30 = vpop.f32.mrb[22].mxu1  ;;  %v1265_v31 = vadd.f32 %v2891_v17, %v1264_v19 }
 0x279   : > { %2216 = vtanh.f32 %v1273_v28  ;;  %v1276_v51 = vadd.f32 %v1913_v30, %v2891_v17  ;;  %v1267_v32 = vpop.f32.mrb[23].mxu1  ;;  %1409 = vrot.lane.b32.xlu1 %v2215_v29, %s2355_s13 }
 0x27a   : > { %v1268_v34 = vadd.f32 %v2891_v17, %v1267_v32 }
 0x27b   : > { %2218 = vtanh.f32 %v1276_v51 }
 0x27c   : > { %2220 = vtanh.f32 %v1265_v31 }
 0x27d   : > { %2222 = vtanh.f32 %v1268_v34 }
 0x283   : > { %v2217_v38 = vpop.eup %2216 }
 0x284   : > { %1419 = vrot.lane.b32.xlu0 %v2217_v38, %s2355_s13 }
 0x285   : > { %v2219_v41 = vpop.eup %2218  ;;  %v1916_v43 = vpop.f32.mrb[24].mxu1 }
 0x286   : > { %v1289_v2 = vadd.f32 %v1916_v43, %v2891_v17  ;;  %1421 = vrot.lane.b32.xlu1 %v2219_v41, %s2355_s13  ;;  %v1280_v3 = vpop.f32.mrb[25].mxu1  ;;  %v2221_v57 = vpop.eup %2220 }
 0x287   : > { %v1917_v44 = vpop.f32.mrb[26].mxu1  ;;  %v1281_v45 = vadd.f32 %v2891_v17, %v1280_v3  ;;  %v2223_v37 = vpop.eup %2222 }
 0x288   : > { %2224 = vtanh.f32 %v1289_v2  ;;  %v1292_v47 = vadd.f32 %v1917_v44, %v2891_v17  ;;  %1415 = vrot.lane.b32.xlu0 %v2221_v57, %s2355_s13  ;;  %v1283_v48 = vpop.f32.mrb[27].mxu1 }
 0x289   : > { %v1284_v49 = vadd.f32 %v2891_v17, %v1283_v48 }
 0x28a   : > { %2226 = vtanh.f32 %v1292_v47  ;;  %1417 = vrot.lane.b32.xlu1 %v2223_v37, %s2355_s13 }
 0x28b   : > { %2228 = vtanh.f32 %v1281_v45 }
 0x28c   : > { %2230 = vtanh.f32 %v1284_v49 }
 0x292   : > { %v2225_v50 = vpop.eup %2224 }
 0x293   : > { %1427 = vrot.lane.b32.xlu0 %v2225_v50, %s2355_s13 }
 0x294   : > { %v2227_v52 = vpop.eup %2226 }
 0x295   : > { %v1920_v53 = vpop.f32.mrb[28].mxu1  ;;  %1429 = vrot.lane.b32.xlu1 %v2227_v52, %s2355_s13  ;;  %v2229_v58 = vpop.eup %2228 }
 0x296   : > { %v1296_v55 = vpop.f32.mrb[29].mxu1  ;;  %v2231_v10 = vpop.eup %2230  ;;  %v1305_v59 = vadd.f32 %v1920_v53, %v2891_v17 }
 0x297   : > { %v1297_v13 = vadd.f32 %v2891_v17, %v1296_v55  ;;  %v1921_v7 = vpop.f32.mrb[30].mxu1  ;;  %1423 = vrot.lane.b32.xlu0 %v2229_v58, %s2355_s13 }
 0x298   : > { %v1299_v9 = vpop.f32.mrb[31].mxu1  ;;  %v1308_v61 = vadd.f32 %v1921_v7, %v2891_v17 }
 0x299   : > { %2232 = vtanh.f32 %v1297_v13  ;;  %v1300_v60 = vadd.f32 %v2891_v17, %v1299_v9  ;;  %1425 = vrot.lane.b32.xlu1 %v2231_v10, %s2355_s13  ;;  %v2934_v17 = vpop.permute.xlu1 %1373 }
 0x29b   : > { %2234 = vtanh.f32 %v1300_v60 }
 0x29c   : > { %2236 = vtanh.f32 %v1305_v59 }
 0x29d   : > { %2238 = vtanh.f32 %v1308_v61 }
 0x2a3   : > { %v2233_v62 = vpop.eup %2232 }
 0x2a4   : > { %1431 = vrot.lane.b32.xlu0 %v2233_v62, %s2355_s13 }
 0x2a5   : > { %v2235_v63 = vpop.eup %2234 }
 0x2a6   : > { %1433 = vrot.lane.b32.xlu1 %v2235_v63, %s2355_s13  ;;  %v2237_v0 = vpop.eup %2236 }
 0x2a7   : > { %v2239_v1 = vpop.eup %2238 }
 0x2a8   : > { %1435 = vrot.lane.b32.xlu0 %v2237_v0, %s2355_s13 }
 0x2aa   : > { %1437 = vrot.lane.b32.xlu1 %v2239_v1, %s2355_s13  ;;  %s2246_s13 = scalar_lea.vmem %s2245_s12, 4096 }
 0x2ab   : > { %p2248_p6 = scmp.lt.s32.totalorder %s2246_s13, %s2240_s28 }
 0x2ad   : > { %p2249_p8 = por %p2248_p6, %p2247_p4 }
 0x2af   : > { %p2250_p9 = pnand %p2249_p8, %p2243_p3 }
 0x2e5   : > { %v1412_v18 = vpop.permute.xlu0 %1411 }
 0x2e6   : > { %v1458_v15 = vsel %vm1455_vm6, %v1348_v46, %v1412_v18 }
 0x2e7   : > { %v1475_v16 = vsel %vm1472_vm7, %v1458_v15, 0.0  ;;  %v1414_v36 = vpop.permute.xlu1 %1413 }
 0x2e8   : > { %1491 = vst [vmem:[%s2938_s25 + $0x10] sm:$0xff] %v1475_v16  ;;  %v1459_v35 = vsel %vm1455_vm6, %v1350_v40, %v1414_v36 }
 0x2e9   : > { %v1476_v22 = vsel %vm1472_vm7, %v1459_v35, 0.0  ;;  %v1408_v23 = vpop.permute.xlu0 %1407 }
 0x2ea   : > { %1492 = vst [vmem:[%s2938_s25 + $0x18] sm:$0xff] %v1476_v22  ;;  %v1456_v33 = vsel %vm1455_vm6, %v1344_v39, %v1408_v23 }
 0x2eb   : > { %v1473_v24 = vsel %vm1472_vm7, %v1456_v33, 0.0  ;;  %v1410_v6 = vpop.permute.xlu1 %1409 }
 0x2ec   : > { %1489 = vst [vmem:[%s2938_s25] sm:$0xff] %v1473_v24  ;;  %v1457_v26 = vsel %vm1455_vm6, %v1346_v25, %v1410_v6 }
 0x2ed   : > { %v1474_v27 = vsel %vm1472_vm7, %v1457_v26, 0.0 }
 0x2ee   : > { %1490 = vst [vmem:[%s2938_s25 + $0x8] sm:$0xff] %v1474_v27 }
 0x2f6   : > { %v1420_v28 = vpop.permute.xlu0 %1419 }
 0x2f7   : > { %v1462_v19 = vsel %vm1455_vm6, %v1356_v5, %v1420_v28 }
 0x2f8   : > { %v1479_v29 = vsel %vm1472_vm7, %v1462_v19, 0.0  ;;  %v1422_v30 = vpop.permute.xlu1 %1421 }
 0x2f9   : > { %1495 = vst [vmem:[%s2938_s25 + $0x30] sm:$0xff] %v1479_v29  ;;  %v1463_v31 = vsel %vm1455_vm6, %v1358_v21, %v1422_v30 }
 0x2fa   : > { %v1480_v51 = vsel %vm1472_vm7, %v1463_v31, 0.0  ;;  %v1416_v32 = vpop.permute.xlu0 %1415 }
 0x2fb   : > { %1496 = vst [vmem:[%s2938_s25 + $0x38] sm:$0xff] %v1480_v51  ;;  %v1460_v34 = vsel %vm1455_vm6, %v1352_v42, %v1416_v32 }
 0x2fc   : > { %v1477_v38 = vsel %vm1472_vm7, %v1460_v34, 0.0  ;;  %v1418_v41 = vpop.permute.xlu1 %1417 }
 0x2fd   : > { %1493 = vst [vmem:[%s2938_s25 + $0x20] sm:$0xff] %v1477_v38  ;;  %v1461_v43 = vsel %vm1455_vm6, %v1354_v4, %v1418_v41 }
 0x2fe   : > { %v1478_v2 = vsel %vm1472_vm7, %v1461_v43, 0.0 }
 0x2ff   : > { %1494 = vst [vmem:[%s2938_s25 + $0x28] sm:$0xff] %v1478_v2 }
 0x305   : > { %v1428_v3 = vpop.permute.xlu0 %1427 }
 0x306   : > { %v1466_v57 = vsel %vm1455_vm6, %v1364_v11, %v1428_v3 }
 0x307   : > { %v1483_v44 = vsel %vm1472_vm7, %v1466_v57, 0.0  ;;  %v1430_v45 = vpop.permute.xlu1 %1429 }
 0x308   : > { %1499 = vst [vmem:[%s2938_s25 + $0x50] sm:$0xff] %v1483_v44  ;;  %v1467_v47 = vsel %vm1455_vm6, %v1366_v12, %v1430_v45 }
 0x309   : > { %v1484_v48 = vsel %vm1472_vm7, %v1467_v47, 0.0  ;;  %v1424_v37 = vpop.permute.xlu0 %1423 }
 0x30a   : > { %1500 = vst [vmem:[%s2938_s25 + $0x58] sm:$0xff] %v1484_v48  ;;  %v1464_v49 = vsel %vm1455_vm6, %v1360_v20, %v1424_v37 }
 0x30b   : > { %v1481_v50 = vsel %vm1472_vm7, %v1464_v49, 0.0  ;;  %v1426_v52 = vpop.permute.xlu1 %1425 }
 0x30c   : > { %1497 = vst [vmem:[%s2938_s25 + $0x40] sm:$0xff] %v1481_v50  ;;  %v1465_v53 = vsel %vm1455_vm6, %v1362_v8, %v1426_v52 }
 0x30d   : > { %v1482_v58 = vsel %vm1472_vm7, %v1465_v53, 0.0 }
 0x30e   : > { %1498 = vst [vmem:[%s2938_s25 + $0x48] sm:$0xff] %v1482_v58 }
 0x316   : > { %v1432_v55 = vpop.permute.xlu0 %1431 }
 0x317   : > { %v1468_v13 = vsel %vm1455_vm6, %v2925_v14, %v1432_v55 }
 0x318   : > { %v1485_v7 = vsel %vm1472_vm7, %v1468_v13, 0.0  ;;  %v1434_v10 = vpop.permute.xlu1 %1433 }
 0x319   : > { %1501 = vst [vmem:[%s2938_s25 + $0x60] sm:$0xff] %v1485_v7  ;;  %v1469_v9 = vsel %vm1455_vm6, %v2927_v56, %v1434_v10 }
 0x31a   : > { %v1486_v59 = vsel %vm1472_vm7, %v1469_v9, 0.0  ;;  %v1436_v60 = vpop.permute.xlu0 %1435 }
 0x31b   : > { %1502 = vst [vmem:[%s2938_s25 + $0x68] sm:$0xff] %v1486_v59  ;;  %v1470_v61 = vsel %vm1455_vm6, %v2930_v54, %v1436_v60 }
 0x31c   : > { %v1487_v62 = vsel %vm1472_vm7, %v1470_v61, 0.0  ;;  %v1438_v63 = vpop.permute.xlu1 %1437 }
 0x31d   : > { %1503 = vst [vmem:[%s2938_s25 + $0x70] sm:$0xff] %v1487_v62  ;;  %v1471_v0 = vsel %vm1455_vm6, %v2934_v17, %v1438_v63 }
 0x31e   : > { %v1488_v1 = vsel %vm1472_vm7, %v1471_v0, 0.0 }
 0x31f   : > { %1504 = vst [vmem:[%s2938_s25 + $0x78] sm:$0xff] %v1488_v1 }
 0x320   : > { %2253 = shalt.err (!%p2250_p9)
}
 0x321   : > { %s2254_s14 = scalar_lea.hbm %s2992_s6, 2048  ;;  %s2258_s26 = scalar_lea.hbm %s3066_s5, 16384 }
 0x322   : > { %p2255_p10 = scmp.ne.s32.totalorder %s2992_s6, %s2254_s14  ;;  %p2259_p13 = scmp.lt.u32.totalorder %s2992_s6, %s3066_s5 }
 0x323   : > { %p2260_p0 = scmp.lt.u32.totalorder %s2258_s26, %s2254_s14  ;;  %p2262_p2 = scmp.lt.u32.totalorder %s2254_s14, %s2992_s6 }
 0x324   : > { %p2256_p11 = pnand %p2255_p10, %p2451_p5 }
 0x325   : > { %p2261_p1 = por %p2260_p0, %p2259_p13 }
 0x326   : > { %p2257_p12 = pneg %p2256_p11 }
 0x327   : > { %p2263_p3 = por %p2262_p2, %p2261_p1 }
 0x329   : > { %p2264_p4 = pnand %p2263_p3, %p2257_p12 }
 0x32b   : > { %2267 = shalt.err (!%p2264_p4)
}
 0x32c   : > { %s2357_s30 = smov 128   ;;  %s2358_s7 = smov 8  }
 0x32d   : > { %1925 = dma.vmem_to_hbm [thread:$0]  (%p2451_p5), %s2994_s21, 2048, %s2992_s6, %s3003_s10, %s2357_s30, %s2357_s30, %s2358_s7  }
 0x32e PF: > { %p1931_p6 = scmp.ge.s32.totalorder %s2350_s27, 2  ;;  %s1538_s17 = sand.u32 1, %s2314_s18  }
 0x32f   : > { %s1539_s22 = scalar_lea.sflag [#allocation3], %s1538_s17 }
 0x330   : > { %p1928_p8 = pnand %p1931_p6, %p2458_p7 }
 0x332   : > { %2309 = dma.done.wait (!%p1928_p8), %s1539_s22, 2048  }
 0x333   : > { %2311 = vsyncadd (!%p1928_p8), %s1539_s22, 4294965248  ;;  %s18_s27 = sadd.s32 1, %s2350_s27   ;;  %s3083_s21 = sld [smem:[#allocation5_spill]] }
 0x334   : > { %p15_p9 = scmp.ge.s32.totalorder %s18_s27, 10   ;;  %s3084_s22 = sld [smem:[#allocation6_spill]] }
 0x335   : > { %s3085_s23 = sld [smem:[#allocation7_spill]]  ;;  %s3086_s24 = sld [smem:[#allocation8_spill]] }
 0x336   : > { %s3087_s25 = sld [smem:[#allocation9_spill]]  ;;  %s3088_s26 = sld [smem:[#allocation10_spill]] }
 0x337   : > { %s3089_s18 = smov %s2318_s19  ;;  %s3090_s19 = smov %s2322_s20 }
 0x338   : > { %s3091_s20 = smov %s2474_s16  ;;  %17 = sbr.rel (!%p15_p9) target bundleno = 6 (0x6), region = 82 }
 0x33f   :  { %1544 = vsyncpa [#allocation3], 1 }
 0x340   :  { %1546 = vsyncpa [#allocation3 + $0x1], 1 }

</bundles_post_ra>
